<compile_context>
chip_gen: v7x
topology: tpu7x:2x2x1
jax: 0.10.0
libtpu: 0.0.40
codegen_flags: <defaults>
</compile_context>

<pallas_src>
import jax
import jax.numpy as jnp
import numpy as np
from jax import lax
from jax.experimental import pallas as pl
from jax.experimental.pallas import tpu as pltpu


def unet_up_block_forward(x_nchw, bridge_nchw, params):
    """Forward of UNetUpBlock(in_size, out_size, 'upconv', padding=True, batch_norm=False)."""
    wt_up, b_up, w1, b1, w2, b2 = params
    N, Cin, H0, W0 = x_nchw.shape
    Cout = wt_up.shape[1]                       # out_size
    Cb = bridge_nchw.shape[1]                   # bridge channels
    Ccat = Cout + Cb                            # conv1 input channels (== in_size)
    Cmid = w1.shape[0]                          # out_size
    assert w1.shape[1] == Ccat and w2.shape[1] == Cmid

    H, W = 2 * H0, 2 * W0                       # upsampled spatial size
    Hp, Wp = H + 2, W + 2                       # +1 pixel zero halo each side
    PB = Hp * Wp                                # padded pixels per image
    NP = N * PB                                 # padded pixels, all images (lane axis)
    NPc = ((NP + 127) // 128) * 128             # compute window rounded to full lane tiles
    MARGIN = 128                                # lane margin so tap shifts never go OOB
    assert Wp + 1 <= MARGIN
    BUFW = NPc + 2 * MARGIN                     # width of padded activation buffers
    NHW0 = N * H0 * W0                          # low-res pixels, all images
    f32, bf16 = jnp.float32, jnp.bfloat16

    # ---- inputs reshaped to the lane-dense [channels, batch*spatial] layout -------------
    x_flat = jnp.transpose(x_nchw, (1, 0, 2, 3)).reshape(Cin, NHW0).astype(bf16)

    # bridge: center-crop to (H, W), 1px zero pad, flatten to padded-flat columns at lane
    # offset MARGIN; shipped bf16 (cat is bf16-rounded before conv1 anyway).
    Hb, Wb = bridge_nchw.shape[2], bridge_nchw.shape[3]
    dy0, dx0 = (Hb - H) // 2, (Wb - W) // 2
    crop = bridge_nchw[:, :, dy0:dy0 + H, dx0:dx0 + W]
    crop = jnp.pad(crop, ((0, 0), (0, 0), (1, 1), (1, 1)))            # [N, Cb, Hp, Wp]
    crop = jnp.transpose(crop, (1, 0, 2, 3)).reshape(Cb, NP)          # [Cb, NP]
    crop = jnp.pad(crop, ((0, 0), (MARGIN, BUFW - MARGIN - NP))).astype(bf16)

    # upconv weight: torch [Cin, Cout, 2, 2] -> per-phase [4, Cout, Cin]
    wup = jnp.transpose(wt_up, (2, 3, 1, 0)).reshape(4, Cout, Cin).astype(bf16)
    bup_col = b_up.reshape(Cout, 1).astype(f32)

    # 0/1 scatter matrix: routes (phase, n, i, j) -> column MARGIN + n*PB + (1+2i+ky)*Wp +
    # (1+2j+kx).  Halo / margin / tail columns are all-zero => exact zero padding for conv1.
    ph = np.arange(4)[:, None, None, None]
    nn = np.arange(N)[None, :, None, None]
    ii = np.arange(H0)[None, None, :, None]
    jj = np.arange(W0)[None, None, None, :]
    rows = (ph * NHW0 + nn * (H0 * W0) + ii * W0 + jj).reshape(-1)
    cols = (MARGIN + nn * PB + (1 + 2 * ii + ph // 2) * Wp
            + (1 + 2 * jj + ph % 2)).reshape(-1)
    scat_np = np.zeros((4 * NHW0, BUFW), np.float32)
    scat_np[rows, cols] = 1.0
    scat = jnp.asarray(scat_np, dtype=bf16)

    # interior mask over the NPc compute window (1 = real pixel, 0 = halo / tail pad)
    cc = np.arange(NPc)
    pyy, pxx = (cc % PB) // Wp, (cc % PB) % Wp
    interior = (cc < NP) & (pyy >= 1) & (pyy <= H) & (pxx >= 1) & (pxx <= W)
    mask = jnp.asarray(interior.reshape(1, NPc).astype(np.float32))

    # conv weights: torch [co, ci, 3, 3] -> tap-major [co, 9*ci] matching the slab row order
    w1mat = jnp.transpose(w1, (0, 2, 3, 1)).reshape(Cmid, 9 * Ccat).astype(bf16)
    w2mat = jnp.transpose(w2, (0, 2, 3, 1)).reshape(Cout, 9 * Cmid).astype(bf16)
    b1col = b1.reshape(Cmid, 1).astype(f32)
    b2col = b2.reshape(Cout, 1).astype(f32)

    def kernel(x_ref, crop_ref, wup_ref, bup_ref, scat_ref,
               w1_ref, b1_ref, w2_ref, b2_ref, mask_ref,
               o_ref, cat_ref, h1_ref, slab1_ref, slab2_ref):
        # -- 1. ConvTranspose2d(k=2,s=2): 4 phase matmuls, bias read once ----------------
        x = x_ref[...]                                          # [Cin, NHW0] bf16
        bup = bup_ref[...]                                      # [Cout, 1]   (hoisted)
        ups = [jnp.dot(wup_ref[p], x, preferred_element_type=jnp.float32) + bup
               for p in range(4)]                               # 4 x [Cout, NHW0]
        up_all = jnp.concatenate(ups, axis=1).astype(jnp.bfloat16)   # [Cout, 4*NHW0]

        # -- 2. pixel-shuffle + zero-pad via one 0/1 scatter matmul (exact routing) ------
        up_pad = jnp.dot(up_all, scat_ref[...],
                         preferred_element_type=jnp.float32)    # [Cout, BUFW]

        # -- 3. channel concat with the pre-cropped / pre-padded bridge (sublane rows) ---
        cat_ref[0:Cout, :] = up_pad
        cat_ref[Cout:Ccat, :] = crop_ref[...].astype(jnp.float32)

        # -- 4. conv1 + ReLU: im2col slab (9 lane-shifted copies) + ONE K=9*Ccat matmul --
        for k in range(9):
            off = (k // 3 - 1) * Wp + (k % 3 - 1)
            slab1_ref[k * Ccat:(k + 1) * Ccat, :] = (
                cat_ref[:, MARGIN + off:MARGIN + off + NPc])
        h1 = jnp.dot(w1_ref[...], slab1_ref[...].astype(jnp.bfloat16),
                     preferred_element_type=jnp.float32)        # [Cmid, NPc]
        h1 = jnp.maximum(h1 + b1_ref[...], 0.0)
        h1 = jnp.where(mask_ref[...] > 0.5, h1, 0.0)            # restore zero halo for conv2

        zmargin = jnp.zeros((Cmid, MARGIN), jnp.float32)        # margins read by tap shifts
        h1_ref[:, 0:MARGIN] = zmargin
        h1_ref[:, MARGIN + NPc:BUFW] = zmargin
        h1_ref[:, MARGIN:MARGIN + NPc] = h1

        # -- 5. conv2 + ReLU: same trick, ONE K=9*Cmid matmul; lane-dense output store ---
        for k in range(9):
            off = (k // 3 - 1) * Wp + (k % 3 - 1)
            slab2_ref[k * Cmid:(k + 1) * Cmid, :] = (
                h1_ref[:, MARGIN + off:MARGIN + off + NPc])
        h2 = jnp.dot(w2_ref[...], slab2_ref[...].astype(jnp.bfloat16),
                     preferred_element_type=jnp.float32)        # [Cout, NPc]
        o_ref[...] = jnp.maximum(h2 + b2_ref[...], 0.0)

    vmem_spec = pl.BlockSpec(memory_space=pltpu.MemorySpace.VMEM)
    out2d = pl.pallas_call(
        kernel,
        out_shape=jax.ShapeDtypeStruct((Cout, NPc), f32),
        in_specs=[vmem_spec] * 10,
        out_specs=vmem_spec,
        scratch_shapes=[
            pltpu.VMEM((Ccat, BUFW), f32),        # padded cat activation
            pltpu.VMEM((Cmid, BUFW), f32),        # padded conv1 output
            pltpu.VMEM((9 * Ccat, NPc), f32),     # conv1 im2col slab
            pltpu.VMEM((9 * Cmid, NPc), f32),     # conv2 im2col slab
        ],
        compiler_params=pltpu.CompilerParams(vmem_limit_bytes=32 * 1024 * 1024),
    )(x_flat, crop, wup, bup_col, scat, w1mat, b1col, w2mat, b2col, mask)

    # [Cout, padded-flat] -> NCHW (drop halo columns; tiny XLA reshape / transpose)
    out = out2d[:, :NP].reshape(Cout, N, Hp, Wp)[:, :, 1:1 + H, 1:1 + W]
    return jnp.transpose(out, (1, 0, 2, 3))


# --------------------------- precision-matched reference ------------------------------ #

def reference_forward(x, bridge, params):
    """Pure-JAX reference mirroring the kernel's numerics: bf16 operands for every
    matmul/conv (f32 accumulation) and bf16 rounding of the two intermediates."""
    wt_up, b_up, w1, b1, w2, b2 = params
    f32 = jnp.float32
    r = lambda a: a.astype(jnp.bfloat16).astype(f32)

    N, Cin, H0, W0 = x.shape
    Cout = wt_up.shape[1]
    xq, wtq = r(x), r(wt_up)
    up = jnp.zeros((N, Cout, 2 * H0, 2 * W0), f32)
    for ky in range(2):
        for kx in range(2):
            contrib = jnp.einsum('ncij,co->noij', xq, wtq[:, :, ky, kx],
                                 precision=lax.Precision.HIGHEST)
            up = up.at[:, :, ky::2, kx::2].set(contrib)
    up = up + b_up[None, :, None, None]
    H, W = 2 * H0, 2 * W0
    Hb, Wb = bridge.shape[2], bridge.shape[3]
    dy, dx = (Hb - H) // 2, (Wb - W) // 2
    crop = bridge[:, :, dy:dy + H, dx:dx + W]
    cat = r(jnp.concatenate([up, crop], axis=1))          # kernel rounds cat to bf16

    def conv3(xin, w, b):
        return lax.conv_general_dilated(
            xin, r(w), window_strides=(1, 1), padding=((1, 1), (1, 1)),
            dimension_numbers=('NCHW', 'OIHW', 'NCHW'),
            precision=lax.Precision.HIGHEST) + b[None, :, None, None]

    h = r(jnp.maximum(conv3(cat, w1, b1), 0.0))           # kernel rounds h1 to bf16
    h = jnp.maximum(conv3(h, w2, b2), 0.0)
    return h


# ------------------------------------ main --------------------------------------------- #

if __name__ == "__main__":
    key = jax.random.PRNGKey(0)
    ks = jax.random.split(key, 8)

    in_size, out_size = 8, 4        # UNetUpBlock(in_size=8, out_size=4, 'upconv', True, False)
    N, H0, W0 = 2, 8, 8             # x:      [2, 8, 8, 8]   (NCHW)
    Hb, Wb = 20, 20                 # bridge: [2, 4, 20, 20] (NCHW), exercises center_crop

    x = jax.random.normal(ks[0], (N, in_size, H0, W0), jnp.float32)
    bridge = jax.random.normal(ks[1], (N, out_size, Hb, Wb), jnp.float32)

    wt_up = 0.2 * jax.random.normal(ks[2], (in_size, out_size, 2, 2), jnp.float32)
    b_up = 0.1 * jax.random.normal(ks[3], (out_size,), jnp.float32)
    w1 = 0.2 * jax.random.normal(ks[4], (out_size, in_size, 3, 3), jnp.float32)
    b1 = 0.1 * jax.random.normal(ks[5], (out_size,), jnp.float32)
    w2 = 0.2 * jax.random.normal(ks[6], (out_size, out_size, 3, 3), jnp.float32)
    b2 = 0.1 * jax.random.normal(ks[7], (out_size,), jnp.float32)
    params = (wt_up, b_up, w1, b1, w2, b2)

    out = jax.block_until_ready(jax.jit(unet_up_block_forward)(x, bridge, params))
    ref = jax.block_until_ready(reference_forward(x, bridge, params))
    np.testing.assert_allclose(np.asarray(out), np.asarray(ref), rtol=2e-3, atol=2e-3)
    print("KERNEL_OK")
</pallas_src>

<mosaic_0001>
module attributes {stable_mosaic.version = 11 : i64} {
  func.func @kernel(%arg0: memref<8x128xbf16, #tpu.memory_space<vmem>>, %arg1: memref<4x1024xbf16, #tpu.memory_space<vmem>>, %arg2: memref<4x4x8xbf16, #tpu.memory_space<vmem>>, %arg3: memref<4x1xf32, #tpu.memory_space<vmem>>, %arg4: memref<512x1024xbf16, #tpu.memory_space<vmem>>, %arg5: memref<4x72xbf16, #tpu.memory_space<vmem>>, %arg6: memref<4x1xf32, #tpu.memory_space<vmem>>, %arg7: memref<4x36xbf16, #tpu.memory_space<vmem>>, %arg8: memref<4x1xf32, #tpu.memory_space<vmem>>, %arg9: memref<1x768xf32, #tpu.memory_space<vmem>>, %arg10: memref<4x768xf32, #tpu.memory_space<vmem>>, %arg11: memref<8x1024xf32, #tpu.memory_space<vmem>>, %arg12: memref<4x1024xf32, #tpu.memory_space<vmem>>, %arg13: memref<72x768xf32, #tpu.memory_space<vmem>>, %arg14: memref<36x768xf32, #tpu.memory_space<vmem>>) attributes {dimension_semantics = [], scalar_prefetch = 0 : i64, scratch_operands = 4 : i64, tpu.core_type = #tpu.core_type<tc>} {
    %c0 = arith.constant 0 : index
    %c0_0 = arith.constant 0 : index
    %0 = vector.load %arg0[%c0, %c0_0] : memref<8x128xbf16, #tpu.memory_space<vmem>>, vector<8x128xbf16>
    %c0_1 = arith.constant 0 : index
    %c0_2 = arith.constant 0 : index
    %1 = vector.load %arg3[%c0_1, %c0_2] : memref<4x1xf32, #tpu.memory_space<vmem>>, vector<4x1xf32>
    %c0_3 = arith.constant 0 : index
    %c0_4 = arith.constant 0 : index
    %c0_5 = arith.constant 0 : index
    %2 = vector.load %arg2[%c0_3, %c0_4, %c0_5] : memref<4x4x8xbf16, #tpu.memory_space<vmem>>, vector<1x4x8xbf16>
    %3 = vector.shape_cast %2 : vector<1x4x8xbf16> to vector<4x8xbf16>
    %cst = arith.constant dense<0.000000e+00> : vector<4x128xf32>
    %4 = tpu.matmul %3, %0, %cst {dimension_numbers = #tpu.dot_dimension_numbers<[1], [0], [0], [1], [0, 0, 1, 1], [], []>} : vector<4x8xbf16>, vector<8x128xbf16>, vector<4x128xf32> -> vector<4x128xf32>
    %5 = vector.broadcast %1 : vector<4x1xf32> to vector<4x128xf32>
    %6 = arith.addf %4, %5 : vector<4x128xf32>
    %c1 = arith.constant 1 : index
    %c0_6 = arith.constant 0 : index
    %c0_7 = arith.constant 0 : index
    %7 = vector.load %arg2[%c1, %c0_6, %c0_7] : memref<4x4x8xbf16, #tpu.memory_space<vmem>>, vector<1x4x8xbf16>
    %8 = vector.shape_cast %7 : vector<1x4x8xbf16> to vector<4x8xbf16>
    %cst_8 = arith.constant dense<0.000000e+00> : vector<4x128xf32>
    %9 = tpu.matmul %8, %0, %cst_8 {dimension_numbers = #tpu.dot_dimension_numbers<[1], [0], [0], [1], [0, 0, 1, 1], [], []>} : vector<4x8xbf16>, vector<8x128xbf16>, vector<4x128xf32> -> vector<4x128xf32>
    %10 = vector.broadcast %1 : vector<4x1xf32> to vector<4x128xf32>
    %11 = arith.addf %9, %10 : vector<4x128xf32>
    %c2 = arith.constant 2 : index
    %c0_9 = arith.constant 0 : index
    %c0_10 = arith.constant 0 : index
    %12 = vector.load %arg2[%c2, %c0_9, %c0_10] : memref<4x4x8xbf16, #tpu.memory_space<vmem>>, vector<1x4x8xbf16>
    %13 = vector.shape_cast %12 : vector<1x4x8xbf16> to vector<4x8xbf16>
    %cst_11 = arith.constant dense<0.000000e+00> : vector<4x128xf32>
    %14 = tpu.matmul %13, %0, %cst_11 {dimension_numbers = #tpu.dot_dimension_numbers<[1], [0], [0], [1], [0, 0, 1, 1], [], []>} : vector<4x8xbf16>, vector<8x128xbf16>, vector<4x128xf32> -> vector<4x128xf32>
    %15 = vector.broadcast %1 : vector<4x1xf32> to vector<4x128xf32>
    %16 = arith.addf %14, %15 : vector<4x128xf32>
    %c3 = arith.constant 3 : index
    %c0_12 = arith.constant 0 : index
    %c0_13 = arith.constant 0 : index
    %17 = vector.load %arg2[%c3, %c0_12, %c0_13] : memref<4x4x8xbf16, #tpu.memory_space<vmem>>, vector<1x4x8xbf16>
    %18 = vector.shape_cast %17 : vector<1x4x8xbf16> to vector<4x8xbf16>
    %cst_14 = arith.constant dense<0.000000e+00> : vector<4x128xf32>
    %19 = tpu.matmul %18, %0, %cst_14 {dimension_numbers = #tpu.dot_dimension_numbers<[1], [0], [0], [1], [0, 0, 1, 1], [], []>} : vector<4x8xbf16>, vector<8x128xbf16>, vector<4x128xf32> -> vector<4x128xf32>
    %20 = vector.broadcast %1 : vector<4x1xf32> to vector<4x128xf32>
    %21 = arith.addf %19, %20 : vector<4x128xf32>
    %22 = tpu.concatenate %6, %11, %16, %21 in 1 : vector<4x128xf32>, vector<4x128xf32>, vector<4x128xf32>, vector<4x128xf32> -> vector<4x512xf32>
    %23 = arith.truncf %22 : vector<4x512xf32> to vector<4x512xbf16>
    %c0_15 = arith.constant 0 : index
    %c0_16 = arith.constant 0 : index
    %24 = vector.load %arg4[%c0_15, %c0_16] : memref<512x1024xbf16, #tpu.memory_space<vmem>>, vector<512x1024xbf16>
    %cst_17 = arith.constant dense<0.000000e+00> : vector<4x1024xf32>
    %25 = tpu.matmul %23, %24, %cst_17 {dimension_numbers = #tpu.dot_dimension_numbers<[1], [0], [0], [1], [0, 0, 1, 1], [], []>} : vector<4x512xbf16>, vector<512x1024xbf16>, vector<4x1024xf32> -> vector<4x1024xf32>
    %c0_18 = arith.constant 0 : index
    %c0_19 = arith.constant 0 : index
    %26 = vector.load %arg11[%c0_18, %c0_19] : memref<8x1024xf32, #tpu.memory_space<vmem>>, vector<4x1024xf32>
    tpu.vector_store %arg11[%c0_18, %c0_19], %25 {strides = array<i32>} : memref<8x1024xf32, #tpu.memory_space<vmem>>, vector<4x1024xf32>,
    %c0_20 = arith.constant 0 : index
    %c0_21 = arith.constant 0 : index
    %27 = vector.load %arg1[%c0_20, %c0_21] : memref<4x1024xbf16, #tpu.memory_space<vmem>>, vector<4x1024xbf16>
    %28 = arith.extf %27 : vector<4x1024xbf16> to vector<4x1024xf32>
    %c4 = arith.constant 4 : index
    %c0_22 = arith.constant 0 : index
    %29 = vector.load %arg11[%c4, %c0_22] : memref<8x1024xf32, #tpu.memory_space<vmem>>, vector<4x1024xf32>
    tpu.vector_store %arg11[%c4, %c0_22], %28 {strides = array<i32>} : memref<8x1024xf32, #tpu.memory_space<vmem>>, vector<4x1024xf32>,
    %c0_23 = arith.constant 0 : index
    %c109 = arith.constant 109 : index
    %30 = vector.load %arg11[%c0_23, %c109] : memref<8x1024xf32, #tpu.memory_space<vmem>>, vector<8x768xf32>
    %c0_24 = arith.constant 0 : index
    %c0_25 = arith.constant 0 : index
    %31 = vector.load %arg13[%c0_24, %c0_25] : memref<72x768xf32, #tpu.memory_space<vmem>>, vector<8x768xf32>
    tpu.vector_store %arg13[%c0_24, %c0_25], %30 {strides = array<i32>} : memref<72x768xf32, #tpu.memory_space<vmem>>, vector<8x768xf32>,
    %c0_26 = arith.constant 0 : index
    %c110 = arith.constant 110 : index
    %32 = vector.load %arg11[%c0_26, %c110] : memref<8x1024xf32, #tpu.memory_space<vmem>>, vector<8x768xf32>
    %c8 = arith.constant 8 : index
    %c0_27 = arith.constant 0 : index
    %33 = vector.load %arg13[%c8, %c0_27] : memref<72x768xf32, #tpu.memory_space<vmem>>, vector<8x768xf32>
    tpu.vector_store %arg13[%c8, %c0_27], %32 {strides = array<i32>} : memref<72x768xf32, #tpu.memory_space<vmem>>, vector<8x768xf32>,
    %c0_28 = arith.constant 0 : index
    %c111 = arith.constant 111 : index
    %34 = vector.load %arg11[%c0_28, %c111] : memref<8x1024xf32, #tpu.memory_space<vmem>>, vector<8x768xf32>
    %c16 = arith.constant 16 : index
    %c0_29 = arith.constant 0 : index
    %35 = vector.load %arg13[%c16, %c0_29] : memref<72x768xf32, #tpu.memory_space<vmem>>, vector<8x768xf32>
    tpu.vector_store %arg13[%c16, %c0_29], %34 {strides = array<i32>} : memref<72x768xf32, #tpu.memory_space<vmem>>, vector<8x768xf32>,
    %c0_30 = arith.constant 0 : index
    %c127 = arith.constant 127 : index
    %36 = vector.load %arg11[%c0_30, %c127] : memref<8x1024xf32, #tpu.memory_space<vmem>>, vector<8x768xf32>
    %c24 = arith.constant 24 : index
    %c0_31 = arith.constant 0 : index
    %37 = vector.load %arg13[%c24, %c0_31] : memref<72x768xf32, #tpu.memory_space<vmem>>, vector<8x768xf32>
    tpu.vector_store %arg13[%c24, %c0_31], %36 {strides = array<i32>} : memref<72x768xf32, #tpu.memory_space<vmem>>, vector<8x768xf32>,
    %c0_32 = arith.constant 0 : index
    %c128 = arith.constant 128 : index
    %38 = vector.load %arg11[%c0_32, %c128] : memref<8x1024xf32, #tpu.memory_space<vmem>>, vector<8x768xf32>
    %c32 = arith.constant 32 : index
    %c0_33 = arith.constant 0 : index
    %39 = vector.load %arg13[%c32, %c0_33] : memref<72x768xf32, #tpu.memory_space<vmem>>, vector<8x768xf32>
    tpu.vector_store %arg13[%c32, %c0_33], %38 {strides = array<i32>} : memref<72x768xf32, #tpu.memory_space<vmem>>, vector<8x768xf32>,
    %c0_34 = arith.constant 0 : index
    %c129 = arith.constant 129 : index
    %40 = vector.load %arg11[%c0_34, %c129] : memref<8x1024xf32, #tpu.memory_space<vmem>>, vector<8x768xf32>
    %c40 = arith.constant 40 : index
    %c0_35 = arith.constant 0 : index
    %41 = vector.load %arg13[%c40, %c0_35] : memref<72x768xf32, #tpu.memory_space<vmem>>, vector<8x768xf32>
    tpu.vector_store %arg13[%c40, %c0_35], %40 {strides = array<i32>} : memref<72x768xf32, #tpu.memory_space<vmem>>, vector<8x768xf32>,
    %c0_36 = arith.constant 0 : index
    %c145 = arith.constant 145 : index
    %42 = vector.load %arg11[%c0_36, %c145] : memref<8x1024xf32, #tpu.memory_space<vmem>>, vector<8x768xf32>
    %c48 = arith.constant 48 : index
    %c0_37 = arith.constant 0 : index
    %43 = vector.load %arg13[%c48, %c0_37] : memref<72x768xf32, #tpu.memory_space<vmem>>, vector<8x768xf32>
    tpu.vector_store %arg13[%c48, %c0_37], %42 {strides = array<i32>} : memref<72x768xf32, #tpu.memory_space<vmem>>, vector<8x768xf32>,
    %c0_38 = arith.constant 0 : index
    %c146 = arith.constant 146 : index
    %44 = vector.load %arg11[%c0_38, %c146] : memref<8x1024xf32, #tpu.memory_space<vmem>>, vector<8x768xf32>
    %c56 = arith.constant 56 : index
    %c0_39 = arith.constant 0 : index
    %45 = vector.load %arg13[%c56, %c0_39] : memref<72x768xf32, #tpu.memory_space<vmem>>, vector<8x768xf32>
    tpu.vector_store %arg13[%c56, %c0_39], %44 {strides = array<i32>} : memref<72x768xf32, #tpu.memory_space<vmem>>, vector<8x768xf32>,
    %c0_40 = arith.constant 0 : index
    %c147 = arith.constant 147 : index
    %46 = vector.load %arg11[%c0_40, %c147] : memref<8x1024xf32, #tpu.memory_space<vmem>>, vector<8x768xf32>
    %c64 = arith.constant 64 : index
    %c0_41 = arith.constant 0 : index
    %47 = vector.load %arg13[%c64, %c0_41] : memref<72x768xf32, #tpu.memory_space<vmem>>, vector<8x768xf32>
    tpu.vector_store %arg13[%c64, %c0_41], %46 {strides = array<i32>} : memref<72x768xf32, #tpu.memory_space<vmem>>, vector<8x768xf32>,
    %c0_42 = arith.constant 0 : index
    %c0_43 = arith.constant 0 : index
    %48 = vector.load %arg5[%c0_42, %c0_43] : memref<4x72xbf16, #tpu.memory_space<vmem>>, vector<4x72xbf16>
    %c0_44 = arith.constant 0 : index
    %c0_45 = arith.constant 0 : index
    %49 = vector.load %arg13[%c0_44, %c0_45] : memref<72x768xf32, #tpu.memory_space<vmem>>, vector<72x768xf32>
    %50 = arith.truncf %49 : vector<72x768xf32> to vector<72x768xbf16>
    %cst_46 = arith.constant dense<0.000000e+00> : vector<4x768xf32>
    %51 = tpu.matmul %48, %50, %cst_46 {dimension_numbers = #tpu.dot_dimension_numbers<[1], [0], [0], [1], [0, 0, 1, 1], [], []>} : vector<4x72xbf16>, vector<72x768xbf16>, vector<4x768xf32> -> vector<4x768xf32>
    %c0_47 = arith.constant 0 : index
    %c0_48 = arith.constant 0 : index
    %52 = vector.load %arg6[%c0_47, %c0_48] : memref<4x1xf32, #tpu.memory_space<vmem>>, vector<4x1xf32>
    %53 = vector.broadcast %52 : vector<4x1xf32> to vector<4x768xf32>
    %54 = arith.addf %51, %53 : vector<4x768xf32>
    %cst_49 = arith.constant 0.000000e+00 : f32
    %55 = vector.broadcast %cst_49 : f32 to vector<4x768xf32>
    %56 = arith.maximumf %54, %55 : vector<4x768xf32>
    %c0_50 = arith.constant 0 : index
    %c0_51 = arith.constant 0 : index
    %57 = vector.load %arg9[%c0_50, %c0_51] : memref<1x768xf32, #tpu.memory_space<vmem>>, vector<1x768xf32>
    %cst_52 = arith.constant 5.000000e-01 : f32
    %58 = vector.broadcast %cst_52 : f32 to vector<1x768xf32>
    %59 = arith.cmpf ogt, %57, %58 : vector<1x768xf32>
    %cst_53 = arith.constant 0.000000e+00 : f32
    %60 = vector.shape_cast %59 : vector<1x768xi1> to vector<1x768xi1>
    %61 = vector.broadcast %60 : vector<1x768xi1> to vector<4x768xi1>
    %62 = vector.broadcast %cst_53 : f32 to vector<4x768xf32>
    %63 = arith.select %61, %56, %62 : vector<4x768xi1>, vector<4x768xf32>
    %cst_54 = arith.constant 0.000000e+00 : f32
    %64 = vector.broadcast %cst_54 : f32 to vector<4x128xf32>
    %c0_55 = arith.constant 0 : index
    %c0_56 = arith.constant 0 : index
    %65 = vector.load %arg12[%c0_55, %c0_56] : memref<4x1024xf32, #tpu.memory_space<vmem>>, vector<4x128xf32>
    tpu.vector_store %arg12[%c0_55, %c0_56], %64 {strides = array<i32>} : memref<4x1024xf32, #tpu.memory_space<vmem>>, vector<4x128xf32>,
    %c0_57 = arith.constant 0 : index
    %c896 = arith.constant 896 : index
    %66 = vector.load %arg12[%c0_57, %c896] : memref<4x1024xf32, #tpu.memory_space<vmem>>, vector<4x128xf32>
    tpu.vector_store %arg12[%c0_57, %c896], %64 {strides = array<i32>} : memref<4x1024xf32, #tpu.memory_space<vmem>>, vector<4x128xf32>,
    %c0_58 = arith.constant 0 : index
    %c128_59 = arith.constant 128 : index
    %67 = vector.load %arg12[%c0_58, %c128_59] : memref<4x1024xf32, #tpu.memory_space<vmem>>, vector<4x768xf32>
    tpu.vector_store %arg12[%c0_58, %c128_59], %63 {strides = array<i32>} : memref<4x1024xf32, #tpu.memory_space<vmem>>, vector<4x768xf32>,
    %c0_60 = arith.constant 0 : index
    %c109_61 = arith.constant 109 : index
    %68 = vector.load %arg12[%c0_60, %c109_61] : memref<4x1024xf32, #tpu.memory_space<vmem>>, vector<4x768xf32>
    %c0_62 = arith.constant 0 : index
    %c0_63 = arith.constant 0 : index
    %69 = vector.load %arg14[%c0_62, %c0_63] : memref<36x768xf32, #tpu.memory_space<vmem>>, vector<4x768xf32>
    tpu.vector_store %arg14[%c0_62, %c0_63], %68 {strides = array<i32>} : memref<36x768xf32, #tpu.memory_space<vmem>>, vector<4x768xf32>,
    %c0_64 = arith.constant 0 : index
    %c110_65 = arith.constant 110 : index
    %70 = vector.load %arg12[%c0_64, %c110_65] : memref<4x1024xf32, #tpu.memory_space<vmem>>, vector<4x768xf32>
    %c4_66 = arith.constant 4 : index
    %c0_67 = arith.constant 0 : index
    %71 = vector.load %arg14[%c4_66, %c0_67] : memref<36x768xf32, #tpu.memory_space<vmem>>, vector<4x768xf32>
    tpu.vector_store %arg14[%c4_66, %c0_67], %70 {strides = array<i32>} : memref<36x768xf32, #tpu.memory_space<vmem>>, vector<4x768xf32>,
    %c0_68 = arith.constant 0 : index
    %c111_69 = arith.constant 111 : index
    %72 = vector.load %arg12[%c0_68, %c111_69] : memref<4x1024xf32, #tpu.memory_space<vmem>>, vector<4x768xf32>
    %c8_70 = arith.constant 8 : index
    %c0_71 = arith.constant 0 : index
    %73 = vector.load %arg14[%c8_70, %c0_71] : memref<36x768xf32, #tpu.memory_space<vmem>>, vector<4x768xf32>
    tpu.vector_store %arg14[%c8_70, %c0_71], %72 {strides = array<i32>} : memref<36x768xf32, #tpu.memory_space<vmem>>, vector<4x768xf32>,
    %c0_72 = arith.constant 0 : index
    %c127_73 = arith.constant 127 : index
    %74 = vector.load %arg12[%c0_72, %c127_73] : memref<4x1024xf32, #tpu.memory_space<vmem>>, vector<4x768xf32>
    %c12 = arith.constant 12 : index
    %c0_74 = arith.constant 0 : index
    %75 = vector.load %arg14[%c12, %c0_74] : memref<36x768xf32, #tpu.memory_space<vmem>>, vector<4x768xf32>
    tpu.vector_store %arg14[%c12, %c0_74], %74 {strides = array<i32>} : memref<36x768xf32, #tpu.memory_space<vmem>>, vector<4x768xf32>,
    %c0_75 = arith.constant 0 : index
    %c128_76 = arith.constant 128 : index
    %76 = vector.load %arg12[%c0_75, %c128_76] : memref<4x1024xf32, #tpu.memory_space<vmem>>, vector<4x768xf32>
    %c16_77 = arith.constant 16 : index
    %c0_78 = arith.constant 0 : index
    %77 = vector.load %arg14[%c16_77, %c0_78] : memref<36x768xf32, #tpu.memory_space<vmem>>, vector<4x768xf32>
    tpu.vector_store %arg14[%c16_77, %c0_78], %76 {strides = array<i32>} : memref<36x768xf32, #tpu.memory_space<vmem>>, vector<4x768xf32>,
    %c0_79 = arith.constant 0 : index
    %c129_80 = arith.constant 129 : index
    %78 = vector.load %arg12[%c0_79, %c129_80] : memref<4x1024xf32, #tpu.memory_space<vmem>>, vector<4x768xf32>
    %c20 = arith.constant 20 : index
    %c0_81 = arith.constant 0 : index
    %79 = vector.load %arg14[%c20, %c0_81] : memref<36x768xf32, #tpu.memory_space<vmem>>, vector<4x768xf32>
    tpu.vector_store %arg14[%c20, %c0_81], %78 {strides = array<i32>} : memref<36x768xf32, #tpu.memory_space<vmem>>, vector<4x768xf32>,
    %c0_82 = arith.constant 0 : index
    %c145_83 = arith.constant 145 : index
    %80 = vector.load %arg12[%c0_82, %c145_83] : memref<4x1024xf32, #tpu.memory_space<vmem>>, vector<4x768xf32>
    %c24_84 = arith.constant 24 : index
    %c0_85 = arith.constant 0 : index
    %81 = vector.load %arg14[%c24_84, %c0_85] : memref<36x768xf32, #tpu.memory_space<vmem>>, vector<4x768xf32>
    tpu.vector_store %arg14[%c24_84, %c0_85], %80 {strides = array<i32>} : memref<36x768xf32, #tpu.memory_space<vmem>>, vector<4x768xf32>,
    %c0_86 = arith.constant 0 : index
    %c146_87 = arith.constant 146 : index
    %82 = vector.load %arg12[%c0_86, %c146_87] : memref<4x1024xf32, #tpu.memory_space<vmem>>, vector<4x768xf32>
    %c28 = arith.constant 28 : index
    %c0_88 = arith.constant 0 : index
    %83 = vector.load %arg14[%c28, %c0_88] : memref<36x768xf32, #tpu.memory_space<vmem>>, vector<4x768xf32>
    tpu.vector_store %arg14[%c28, %c0_88], %82 {strides = array<i32>} : memref<36x768xf32, #tpu.memory_space<vmem>>, vector<4x768xf32>,
    %c0_89 = arith.constant 0 : index
    %c147_90 = arith.constant 147 : index
    %84 = vector.load %arg12[%c0_89, %c147_90] : memref<4x1024xf32, #tpu.memory_space<vmem>>, vector<4x768xf32>
    %c32_91 = arith.constant 32 : index
    %c0_92 = arith.constant 0 : index
    %85 = vector.load %arg14[%c32_91, %c0_92] : memref<36x768xf32, #tpu.memory_space<vmem>>, vector<4x768xf32>
    tpu.vector_store %arg14[%c32_91, %c0_92], %84 {strides = array<i32>} : memref<36x768xf32, #tpu.memory_space<vmem>>, vector<4x768xf32>,
    %c0_93 = arith.constant 0 : index
    %c0_94 = arith.constant 0 : index
    %86 = vector.load %arg7[%c0_93, %c0_94] : memref<4x36xbf16, #tpu.memory_space<vmem>>, vector<4x36xbf16>
    %c0_95 = arith.constant 0 : index
    %c0_96 = arith.constant 0 : index
    %87 = vector.load %arg14[%c0_95, %c0_96] : memref<36x768xf32, #tpu.memory_space<vmem>>, vector<36x768xf32>
    %88 = arith.truncf %87 : vector<36x768xf32> to vector<36x768xbf16>
    %cst_97 = arith.constant dense<0.000000e+00> : vector<4x768xf32>
    %89 = tpu.matmul %86, %88, %cst_97 {dimension_numbers = #tpu.dot_dimension_numbers<[1], [0], [0], [1], [0, 0, 1, 1], [], []>} : vector<4x36xbf16>, vector<36x768xbf16>, vector<4x768xf32> -> vector<4x768xf32>
    %c0_98 = arith.constant 0 : index
    %c0_99 = arith.constant 0 : index
    %90 = vector.load %arg8[%c0_98, %c0_99] : memref<4x1xf32, #tpu.memory_space<vmem>>, vector<4x1xf32>
    %91 = vector.broadcast %90 : vector<4x1xf32> to vector<4x768xf32>
    %92 = arith.addf %89, %91 : vector<4x768xf32>
    %cst_100 = arith.constant 0.000000e+00 : f32
    %93 = vector.broadcast %cst_100 : f32 to vector<4x768xf32>
    %94 = arith.maximumf %92, %93 : vector<4x768xf32>
    %c0_101 = arith.constant 0 : index
    %c0_102 = arith.constant 0 : index
    %95 = vector.load %arg10[%c0_101, %c0_102] : memref<4x768xf32, #tpu.memory_space<vmem>>, vector<4x768xf32>
    tpu.vector_store %arg10[%c0_101, %c0_102], %94 {strides = array<i32>} : memref<4x768xf32, #tpu.memory_space<vmem>>, vector<4x768xf32>,
    return
  }
}

</mosaic_0001>

<bundles_post_ra>
// kernel: unet_up_block_forward.1
= control target key start
LH: loop header
LB: loop body
LE: loop exit
PB: predicated region body
PF: predicated region fallthrough
CT: control target
= control target key end

     0   :  { %vm48_vm0 = vcmask 1043456   ;;  %v3879_v0 = vmov 0.0   ;;  %vm3880_vm1 = vmmov 0   ;;  %vm44_vm2 = vcmask 64512   ;;  %s3883_s13 = smov 19   ;;  %s3885_s14 = smov 1   ;;  %s5243_s0 = inlined_call_operand.vmem [shape: bf16[8,128], index: 0, kind: input, shape index: {}]   ;;  %s5244_s2 = inlined_call_operand.vmem [shape: bf16[4,4,8], index: 2, kind: input, shape index: {}]   ;;  %s5245_s4 = inlined_call_operand.vmem [shape: bf16[512,1024], index: 4, kind: input, shape index: {}]   ;;  %s5246_s3 = inlined_call_operand.vmem [shape: f32[4,1], index: 3, kind: input, shape index: {}]   ;;  %s5247_s1 = inlined_call_operand.vmem [shape: bf16[4,1024], index: 1, kind: input, shape index: {}]   ;;  %s5248_s6 = inlined_call_operand.vmem [shape: f32[4,1], index: 6, kind: input, shape index: {}]   ;;  %s5249_s5 = inlined_call_operand.vmem [shape: bf16[4,72], index: 5, kind: input, shape index: {}]   ;;  %s5250_s9 = inlined_call_operand.vmem [shape: f32[1,768], index: 9, kind: input, shape index: {}]   ;;  %s5251_s8 = inlined_call_operand.vmem [shape: f32[4,1], index: 8, kind: input, shape index: {}]   ;;  %s5252_s7 = inlined_call_operand.vmem [shape: bf16[4,36], index: 7, kind: input, shape index: {}]   ;;  %s5253_s10 = inlined_call_operand.vmem [shape: f32[4,768], index: 10, kind: output, shape index: {}]  }
   0x1   :  { %3690 = vmatprep.subr.bf16.mxu0 %v3879_v0  ;;  %2798 = vst [vmem:[#allocation3] sm:$0xf] %v3879_v0  ;;  %2799 = vst [vmem:[#allocation3 + $0x1c] sm:$0xf] %v3879_v0  ;;  %3696 = vmatprep.subr.bf16.mxu1 %v3879_v0  ;;  %v36_v1 = vld [vmem:[%s5243_s0] sm:$0xf] }
   0x2   :  { %v50_v2 = vsel %vm48_vm0, %v36_v1, 0  ;;  %3692 = vmatprep.mubr.msk.bf16.mxu0 %vm3880_vm1, %v3879_v0  ;;  %3698 = vmatprep.mubr.msk.bf16.mxu1 %vm3880_vm1, %v3879_v0  ;;  %v38_v3 = vld [vmem:[%s5244_s2] sm:$0x3]  ;;  %v3408_v4 = vld [vmem:[%s5244_s2 + $0x2] sm:$0x3]  ;;  %v232_v7 = vld [vmem:[%s5245_s4 + $0x8] sm:$0xff] }
   0x3   :  { %3691 = vmatpush3.bf16.msra.mxu0 %v50_v2  ;;  %3697 = vmatpush3.bf16.msra.mxu1 %v50_v2  ;;  %v231_v5 = vld [vmem:[%s5245_s4] sm:$0xff]  ;;  %v236_v8 = vld [vmem:[%s5245_s4 + $0x28] sm:$0xff]  ;;  %v3881_v9 = vmov 0   ;;  %s3886_s15 = smov 127   ;;  %s3887_s16 = smov 110   ;;  %vm2157_vm3 = vcmask 154624  }
   0x4   :  { %v235_v6 = vld [vmem:[%s5245_s4 + $0x20] sm:$0xff]  ;;  %3702 = vmatprep.subr.bf16.mxu0 %v3879_v0  ;;  %3708 = vmatprep.subr.bf16.mxu1 %v3879_v0  ;;  %v3417_v12 = vcombine.high %v232_v7, %v236_v8  ;;  %v240_v15 = vld [vmem:[%s5245_s4 + $0x48] sm:$0xff]  ;;  %v3416_v20 = vcombine.low %v232_v7, %v236_v8  ;;  %s3888_s17 = smov 111   ;;  %s3889_s18 = smov 109   ;;  %vm2204_vm4 = vcmask 146432   ;;  %vm2251_vm5 = vcmask 138240  }
   0x5   :  { %3741 = vset.pattern.permute.xlu0 %v3881_v9  ;;  %v3415_v10 = vcombine.high %v231_v5, %v235_v6  ;;  %3862 = vset.pattern.permute.xlu1 %v3881_v9  ;;  %v37_v11 = vld [vmem:[%s5246_s3] sm:$0xf]  ;;  %v244_v16 = vld [vmem:[%s5245_s4 + $0x68] sm:$0xff]  ;;  %v3410_v17 = vld [vmem:[%s5244_s2 + $0x4] sm:$0x3]  ;;  %v3414_v19 = vcombine.low %v231_v5, %v235_v6  ;;  %s3884_s3 = smov 17  }
   0x6   :  { %3693 = vmatmul.mubr.msk.bf16.vlgmr.msra.gmra.mrb[0].mxu0 %vm44_vm2, %v38_v3  ;;  %3699 = vmatmul.mubr.msk.bf16.vlgmr.msra.gmra.mrb[0].mxu1 %vm44_vm2, %v3408_v4  ;;  %v239_v13 = vld [vmem:[%s5245_s4 + $0x40] sm:$0xff]  ;;  %v3425_v22 = vcombine.high %v240_v15, %v244_v16  ;;  %v248_v25 = vld [vmem:[%s5245_s4 + $0x88] sm:$0xff]  ;;  %v3424_v28 = vcombine.low %v240_v15, %v244_v16  ;;  %vm2298_vm6 = vcmask 7168   ;;  %vm2357_vm7 = vcmask 1039360  }
   0x7   :  { %3703 = vmatpush3.bf16.msra.mxu0 %v50_v2  ;;  %3709 = vmatpush3.bf16.msra.mxu1 %v50_v2  ;;  %v243_v14 = vld [vmem:[%s5245_s4 + $0x60] sm:$0xff]  ;;  %v252_v26 = vld [vmem:[%s5245_s4 + $0xa8] sm:$0xff]  ;;  %vm2404_vm8 = vcmask 908288   ;;  %vm2451_vm9 = vcmask 900096   ;;  %vm2498_vm10 = vcmask 891904   ;;  %vm2608_vm11 = vcmask 588800  }
   0x8   :  { %3704 = vmatprep.mubr.msk.bf16.mxu0 %vm3880_vm1, %v3879_v0  ;;  %3710 = vmatprep.mubr.msk.bf16.mxu1 %vm3880_vm1, %v3879_v0  ;;  %v3412_v18 = vld [vmem:[%s5244_s2 + $0x6] sm:$0x3]  ;;  %v3423_v21 = vcombine.high %v239_v13, %v243_v14  ;;  %v3422_v27 = vcombine.low %v239_v13, %v243_v14  ;;  %v3433_v30 = vcombine.high %v248_v25, %v252_v26  ;;  %v256_v33 = vld [vmem:[%s5245_s4 + $0xc8] sm:$0xff] }
   0x9   :  { %41 = vperm.xlu0 %3741, %v37_v11   ;;  %1767 = vmatprep.subr.bf16.mxu0 %v3415_v10  ;;  %v247_v23 = vld [vmem:[%s5245_s4 + $0x80] sm:$0xff]  ;;  %v260_v34 = vld [vmem:[%s5245_s4 + $0xe8] sm:$0xff]  ;;  %v3432_v36 = vcombine.low %v248_v25, %v252_v26 }
   0xa   :  { %1849 = vmatprep.subr.bf16.mxu1 %v3417_v12  ;;  %v251_v24 = vld [vmem:[%s5245_s4 + $0xa0] sm:$0xff]  ;;  %v3441_v38 = vcombine.high %v256_v33, %v260_v34  ;;  %v264_v41 = vld [vmem:[%s5245_s4 + $0x108] sm:$0xff]  ;;  %v3440_v44 = vcombine.low %v256_v33, %v260_v34 }
   0xb   :  { %v3431_v29 = vcombine.high %v247_v23, %v251_v24  ;;  %v255_v31 = vld [vmem:[%s5245_s4 + $0xc0] sm:$0xff]  ;;  %v3430_v35 = vcombine.low %v247_v23, %v251_v24  ;;  %v268_v42 = vld [vmem:[%s5245_s4 + $0x128] sm:$0xff] }
   0xc   :  { %v259_v32 = vld [vmem:[%s5245_s4 + $0xe0] sm:$0xff]  ;;  %v3449_v46 = vcombine.high %v264_v41, %v268_v42  ;;  %v272_v49 = vld [vmem:[%s5245_s4 + $0x148] sm:$0xff]  ;;  %v3448_v52 = vcombine.low %v264_v41, %v268_v42 }
   0xd   :  { %v3439_v37 = vcombine.high %v255_v31, %v259_v32  ;;  %v263_v39 = vld [vmem:[%s5245_s4 + $0x100] sm:$0xff]  ;;  %v3438_v43 = vcombine.low %v255_v31, %v259_v32  ;;  %v276_v50 = vld [vmem:[%s5245_s4 + $0x168] sm:$0xff] }
   0xe   :  { %3705 = vmatmul.mubr.msk.bf16.vlgmr.msra.gmra.mrb[4].mxu0 %vm44_vm2, %v3410_v17  ;;  %3711 = vmatmul.mubr.msk.bf16.vlgmr.msra.gmra.mrb[4].mxu1 %vm44_vm2, %v3412_v18  ;;  %v267_v40 = vld [vmem:[%s5245_s4 + $0x120] sm:$0xff]  ;;  %v3457_v54 = vcombine.high %v272_v49, %v276_v50  ;;  %v280_v57 = vld [vmem:[%s5245_s4 + $0x188] sm:$0xff]  ;;  %v3456_v60 = vcombine.low %v272_v49, %v276_v50 }
   0xf   :  { %1768 = vmatpush1.bf16.msra.mxu0 %v3414_v19  ;;  %1850 = vmatpush1.bf16.msra.mxu1 %v3416_v20  ;;  %v3447_v45 = vcombine.high %v263_v39, %v267_v40  ;;  %v271_v47 = vld [vmem:[%s5245_s4 + $0x140] sm:$0xff]  ;;  %v3446_v51 = vcombine.low %v263_v39, %v267_v40  ;;  %v284_v58 = vld [vmem:[%s5245_s4 + $0x1a8] sm:$0xff] }
  0x10   :  { %1769 = vmatprep.subr.bf16.mxu0 %v3423_v21  ;;  %1851 = vmatprep.subr.bf16.mxu1 %v3425_v22  ;;  %v275_v48 = vld [vmem:[%s5245_s4 + $0x160] sm:$0xff]  ;;  %v3465_v62 = vcombine.high %v280_v57, %v284_v58  ;;  %v288_v1 = vld [vmem:[%s5245_s4 + $0x1c8] sm:$0xff]  ;;  %v3464_v4 = vcombine.low %v280_v57, %v284_v58 }
  0x11   :  { %v3455_v53 = vcombine.high %v271_v47, %v275_v48  ;;  %v279_v55 = vld [vmem:[%s5245_s4 + $0x180] sm:$0xff]  ;;  %v3454_v59 = vcombine.low %v271_v47, %v275_v48  ;;  %v292_v2 = vld [vmem:[%s5245_s4 + $0x1e8] sm:$0xff] }
  0x12   :  { %v283_v56 = vld [vmem:[%s5245_s4 + $0x1a0] sm:$0xff]  ;;  %v3473_v6 = vcombine.high %v288_v1, %v292_v2  ;;  %v296_v10 = vld [vmem:[%s5245_s4 + $0x208] sm:$0xff]  ;;  %v3472_v13 = vcombine.low %v288_v1, %v292_v2 }
  0x13   :  { %1770 = vmatpush1.bf16.msra.mxu0 %v3422_v27  ;;  %1852 = vmatpush1.bf16.msra.mxu1 %v3424_v28  ;;  %v3463_v61 = vcombine.high %v279_v55, %v283_v56  ;;  %v287_v63 = vld [vmem:[%s5245_s4 + $0x1c0] sm:$0xff]  ;;  %v3462_v3 = vcombine.low %v279_v55, %v283_v56  ;;  %v300_v11 = vld [vmem:[%s5245_s4 + $0x228] sm:$0xff] }
  0x14   :  { %1771 = vmatprep.subr.bf16.mxu0 %v3431_v29  ;;  %1853 = vmatprep.subr.bf16.mxu1 %v3433_v30  ;;  %v291_v0 = vld [vmem:[%s5245_s4 + $0x1e0] sm:$0xff]  ;;  %v3481_v15 = vcombine.high %v296_v10, %v300_v11  ;;  %v304_v18 = vld [vmem:[%s5245_s4 + $0x248] sm:$0xff]  ;;  %v3480_v21 = vcombine.low %v296_v10, %v300_v11 }
  0x15   :  { %v3471_v5 = vcombine.high %v287_v63, %v291_v0  ;;  %v295_v7 = vld [vmem:[%s5245_s4 + $0x200] sm:$0xff]  ;;  %v3470_v12 = vcombine.low %v287_v63, %v291_v0  ;;  %v308_v19 = vld [vmem:[%s5245_s4 + $0x268] sm:$0xff] }
  0x16   :  { %v299_v8 = vld [vmem:[%s5245_s4 + $0x220] sm:$0xff]  ;;  %v3489_v23 = vcombine.high %v304_v18, %v308_v19  ;;  %v312_v26 = vld [vmem:[%s5245_s4 + $0x288] sm:$0xff]  ;;  %v3488_v29 = vcombine.low %v304_v18, %v308_v19 }
  0x17   :  { %1772 = vmatpush1.bf16.msra.mxu0 %v3430_v35  ;;  %1854 = vmatpush1.bf16.msra.mxu1 %v3432_v36  ;;  %v3479_v14 = vcombine.high %v295_v7, %v299_v8  ;;  %v303_v16 = vld [vmem:[%s5245_s4 + $0x240] sm:$0xff]  ;;  %v3478_v20 = vcombine.low %v295_v7, %v299_v8  ;;  %v316_v27 = vld [vmem:[%s5245_s4 + $0x2a8] sm:$0xff] }
  0x18   :  { %1773 = vmatprep.subr.bf16.mxu0 %v3439_v37  ;;  %1855 = vmatprep.subr.bf16.mxu1 %v3441_v38  ;;  %v307_v17 = vld [vmem:[%s5245_s4 + $0x260] sm:$0xff]  ;;  %v3497_v31 = vcombine.high %v312_v26, %v316_v27  ;;  %v320_v34 = vld [vmem:[%s5245_s4 + $0x2c8] sm:$0xff]  ;;  %v3496_v37 = vcombine.low %v312_v26, %v316_v27 }
  0x19   :  { %v3487_v22 = vcombine.high %v303_v16, %v307_v17  ;;  %v311_v24 = vld [vmem:[%s5245_s4 + $0x280] sm:$0xff]  ;;  %v3486_v28 = vcombine.low %v303_v16, %v307_v17  ;;  %v324_v35 = vld [vmem:[%s5245_s4 + $0x2e8] sm:$0xff] }
  0x1a   :  { %v315_v25 = vld [vmem:[%s5245_s4 + $0x2a0] sm:$0xff]  ;;  %v3505_v39 = vcombine.high %v320_v34, %v324_v35  ;;  %v328_v42 = vld [vmem:[%s5245_s4 + $0x308] sm:$0xff] }
  0x1b   :  { %1774 = vmatpush1.bf16.msra.mxu0 %v3438_v43  ;;  %1856 = vmatpush1.bf16.msra.mxu1 %v3440_v44  ;;  %v3495_v30 = vcombine.high %v311_v24, %v315_v25  ;;  %v319_v32 = vld [vmem:[%s5245_s4 + $0x2c0] sm:$0xff]  ;;  %v3494_v36 = vcombine.low %v311_v24, %v315_v25  ;;  %v332_v43 = vld [vmem:[%s5245_s4 + $0x328] sm:$0xff] }
  0x1c   :  { %1775 = vmatprep.subr.bf16.mxu0 %v3447_v45  ;;  %1857 = vmatprep.subr.bf16.mxu1 %v3449_v46  ;;  %v323_v33 = vld [vmem:[%s5245_s4 + $0x2e0] sm:$0xff]  ;;  %v3504_v45 = vcombine.low %v320_v34, %v324_v35  ;;  %v3513_v47 = vcombine.high %v328_v42, %v332_v43  ;;  %v336_v50 = vld [vmem:[%s5245_s4 + $0x348] sm:$0xff] }
  0x1d   :  { %v3503_v38 = vcombine.high %v319_v32, %v323_v33  ;;  %v327_v40 = vld [vmem:[%s5245_s4 + $0x300] sm:$0xff]  ;;  %v3502_v44 = vcombine.low %v319_v32, %v323_v33  ;;  %v344_v58 = vld [vmem:[%s5245_s4 + $0x388] sm:$0xff] }
  0x1e   :  { %v331_v41 = vld [vmem:[%s5245_s4 + $0x320] sm:$0xff] }
  0x1f   :  { %1776 = vmatpush1.bf16.msra.mxu0 %v3446_v51  ;;  %1858 = vmatpush1.bf16.msra.mxu1 %v3448_v52  ;;  %v3511_v46 = vcombine.high %v327_v40, %v331_v41  ;;  %v335_v48 = vld [vmem:[%s5245_s4 + $0x340] sm:$0xff]  ;;  %v340_v51 = vld [vmem:[%s5245_s4 + $0x368] sm:$0xff]  ;;  %v3510_v52 = vcombine.low %v327_v40, %v331_v41 }
  0x20   :  { %1777 = vmatprep.subr.bf16.mxu0 %v3455_v53  ;;  %1859 = vmatprep.subr.bf16.mxu1 %v3457_v54  ;;  %v339_v49 = vld [vmem:[%s5245_s4 + $0x360] sm:$0xff]  ;;  %v3512_v53 = vcombine.low %v328_v42, %v332_v43  ;;  %v3521_v55 = vcombine.high %v336_v50, %v340_v51  ;;  %v376_v40 = vld [vmem:[%s5245_s4 + $0x488] sm:$0xff] }
  0x21   :  { %v3519_v54 = vcombine.high %v335_v48, %v339_v49  ;;  %v343_v56 = vld [vmem:[%s5245_s4 + $0x380] sm:$0xff]  ;;  %v380_v41 = vld [vmem:[%s5245_s4 + $0x4a8] sm:$0xff] }
  0x22   :  { %v347_v57 = vld [vmem:[%s5245_s4 + $0x3a0] sm:$0xff] }
  0x23   :  { %1778 = vmatpush1.bf16.msra.mxu0 %v3454_v59  ;;  %1860 = vmatpush1.bf16.msra.mxu1 %v3456_v60  ;;  %v348_v59 = vld [vmem:[%s5245_s4 + $0x3a8] sm:$0xff]  ;;  %v3518_v60 = vcombine.low %v335_v48, %v339_v49  ;;  %v3526_v0 = vcombine.low %v343_v56, %v347_v57  ;;  %v351_v2 = vld [vmem:[%s5245_s4 + $0x3c0] sm:$0xff] }
  0x24   :  { %1779 = vmatprep.subr.bf16.mxu0 %v3463_v61  ;;  %1861 = vmatprep.subr.bf16.mxu1 %v3465_v62  ;;  %v3520_v61 = vcombine.low %v336_v50, %v340_v51  ;;  %v3527_v62 = vcombine.high %v343_v56, %v347_v57  ;;  %v3529_v63 = vcombine.high %v344_v58, %v348_v59  ;;  %v359_v11 = vld [vmem:[%s5245_s4 + $0x400] sm:$0xff]  ;;  %v384_v51 = vld [vmem:[%s5245_s4 + $0x4c8] sm:$0xff] }
  0x25   :  { %v3528_v1 = vcombine.low %v344_v58, %v348_v59  ;;  %v371_v27 = vld [vmem:[%s5245_s4 + $0x460] sm:$0xff]  ;;  %v3560_v59 = vcombine.low %v376_v40, %v380_v41 }
  0x26   :  { %v383_v48 = vld [vmem:[%s5245_s4 + $0x4c0] sm:$0xff] }
  0x27   :  { %1780 = vmatpush1.bf16.msra.mxu0 %v3462_v3  ;;  %1862 = vmatpush1.bf16.msra.mxu1 %v3464_v4  ;;  %v355_v3 = vld [vmem:[%s5245_s4 + $0x3e0] sm:$0xff]  ;;  %v352_v4 = vld [vmem:[%s5245_s4 + $0x3c8] sm:$0xff] }
  0x28   :  { %1781 = vmatprep.subr.bf16.mxu0 %v3471_v5  ;;  %1863 = vmatprep.subr.bf16.mxu1 %v3473_v6  ;;  %v3535_v5 = vcombine.high %v351_v2, %v355_v3  ;;  %v356_v6 = vld [vmem:[%s5245_s4 + $0x3e8] sm:$0xff]  ;;  %v3534_v7 = vcombine.low %v351_v2, %v355_v3  ;;  %v387_v50 = vld [vmem:[%s5245_s4 + $0x4e0] sm:$0xff] }
  0x29   :  { %v3536_v8 = vcombine.low %v352_v4, %v356_v6  ;;  %v3537_v10 = vcombine.high %v352_v4, %v356_v6  ;;  %v392_v2 = vld [vmem:[%s5245_s4 + $0x508] sm:$0xff]  ;;  %v3566_v4 = vcombine.low %v383_v48, %v387_v50 }
  0x2a   :  { %v396_v3 = vld [vmem:[%s5245_s4 + $0x528] sm:$0xff] }
  0x2b   :  { %1782 = vmatpush1.bf16.msra.mxu0 %v3470_v12  ;;  %1864 = vmatpush1.bf16.msra.mxu1 %v3472_v13  ;;  %v363_v12 = vld [vmem:[%s5245_s4 + $0x420] sm:$0xff]  ;;  %v360_v13 = vld [vmem:[%s5245_s4 + $0x408] sm:$0xff] }
  0x2c   :  { %1783 = vmatprep.subr.bf16.mxu0 %v3479_v14  ;;  %1865 = vmatprep.subr.bf16.mxu1 %v3481_v15  ;;  %v3543_v14 = vcombine.high %v359_v11, %v363_v12  ;;  %v364_v15 = vld [vmem:[%s5245_s4 + $0x428] sm:$0xff]  ;;  %v3542_v16 = vcombine.low %v359_v11, %v363_v12 }
  0x2d   :  { %v3544_v17 = vcombine.low %v360_v13, %v364_v15  ;;  %v3545_v18 = vcombine.high %v360_v13, %v364_v15  ;;  %v400_v11 = vld [vmem:[%s5245_s4 + $0x548] sm:$0xff] }
  0x2e   :  { %v404_v12 = vld [vmem:[%s5245_s4 + $0x568] sm:$0xff] }
  0x2f   :  { %1784 = vmatpush1.bf16.msra.mxu0 %v3478_v20  ;;  %1866 = vmatpush1.bf16.msra.mxu1 %v3480_v21 }
  0x30   :  { %1785 = vmatprep.subr.bf16.mxu0 %v3487_v22  ;;  %1867 = vmatprep.subr.bf16.mxu1 %v3489_v23  ;;  %v367_v22 = vld [vmem:[%s5245_s4 + $0x440] sm:$0xff] }
  0x31   :  { %v3550_v42 = vcombine.low %v367_v22, %v371_v27 }
  0x33   :  { %1786 = vmatpush1.bf16.msra.mxu0 %v3486_v28  ;;  %1868 = vmatpush1.bf16.msra.mxu1 %v3488_v29  ;;  %v368_v28 = vld [vmem:[%s5245_s4 + $0x448] sm:$0xff] }
  0x34   :  { %1787 = vmatprep.subr.bf16.mxu0 %v3495_v30  ;;  %1869 = vmatprep.subr.bf16.mxu1 %v3497_v31  ;;  %v372_v29 = vld [vmem:[%s5245_s4 + $0x468] sm:$0xff] }
  0x35   :  { %v3552_v43 = vcombine.low %v368_v28, %v372_v29 }
  0x37   :  { %1788 = vmatpush1.bf16.msra.mxu0 %v3494_v36  ;;  %1870 = vmatpush1.bf16.msra.mxu1 %v3496_v37  ;;  %v3551_v36 = vcombine.high %v367_v22, %v371_v27  ;;  %v3553_v37 = vcombine.high %v368_v28, %v372_v29  ;;  %v419_v27 = vld [vmem:[%s5245_s4 + $0x5e0] sm:$0xff]  ;;  %v416_v28 = vld [vmem:[%s5245_s4 + $0x5c8] sm:$0xff] }
  0x38   :  { %1789 = vmatprep.subr.bf16.mxu0 %v3503_v38  ;;  %1871 = vmatprep.subr.bf16.mxu1 %v3505_v39  ;;  %v375_v38 = vld [vmem:[%s5245_s4 + $0x480] sm:$0xff]  ;;  %v420_v29 = vld [vmem:[%s5245_s4 + $0x5e8] sm:$0xff] }
  0x39   :  { %v379_v39 = vld [vmem:[%s5245_s4 + $0x4a0] sm:$0xff] }
  0x3a   :  { %v3558_v58 = vcombine.low %v375_v38, %v379_v39 }
  0x3b   :  { %1790 = vmatpush1.bf16.msra.mxu0 %v3502_v44  ;;  %1872 = vmatpush1.bf16.msra.mxu1 %v3504_v45 }
  0x3c   :  { %1791 = vmatprep.subr.bf16.mxu0 %v3511_v46  ;;  %1873 = vmatprep.subr.bf16.mxu1 %v3513_v47  ;;  %v3559_v46 = vcombine.high %v375_v38, %v379_v39  ;;  %v3561_v47 = vcombine.high %v376_v40, %v380_v41  ;;  %v424_v38 = vld [vmem:[%s5245_s4 + $0x608] sm:$0xff]  ;;  %v3600_v41 = vcombine.low %v416_v28, %v420_v29 }
  0x3d   :  { %v428_v39 = vld [vmem:[%s5245_s4 + $0x628] sm:$0xff] }
  0x3f   :  { %1792 = vmatpush1.bf16.msra.mxu0 %v3510_v52  ;;  %1874 = vmatpush1.bf16.msra.mxu1 %v3512_v53  ;;  %v388_v52 = vld [vmem:[%s5245_s4 + $0x4e8] sm:$0xff] }
  0x40   :  { %1793 = vmatprep.subr.bf16.mxu0 %v3519_v54  ;;  %1875 = vmatprep.subr.bf16.mxu1 %v3521_v55 }
  0x43   :  { %1794 = vmatpush1.bf16.msra.mxu0 %v3518_v60  ;;  %1876 = vmatpush1.bf16.msra.mxu1 %v3520_v61 }
  0x44   :  { %1795 = vmatprep.subr.bf16.mxu0 %v3527_v62  ;;  %1877 = vmatprep.subr.bf16.mxu1 %v3529_v63  ;;  %v3567_v62 = vcombine.high %v383_v48, %v387_v50  ;;  %v3569_v63 = vcombine.high %v384_v51, %v388_v52  ;;  %v436_v48 = vld [vmem:[%s5245_s4 + $0x668] sm:$0xff]  ;;  %v3608_v50 = vcombine.low %v424_v38, %v428_v39 }
  0x47   :  { %1796 = vmatpush1.bf16.msra.mxu0 %v3526_v0  ;;  %1878 = vmatpush1.bf16.msra.mxu1 %v3528_v1  ;;  %v391_v0 = vld [vmem:[%s5245_s4 + $0x500] sm:$0xff] }
  0x48   :  { %1797 = vmatprep.subr.bf16.mxu0 %v3535_v5  ;;  %1879 = vmatprep.subr.bf16.mxu1 %v3537_v10  ;;  %v395_v1 = vld [vmem:[%s5245_s4 + $0x520] sm:$0xff]  ;;  %v3568_v5 = vcombine.low %v384_v51, %v388_v52 }
  0x49   :  { %v3575_v6 = vcombine.high %v391_v0, %v395_v1  ;;  %v403_v10 = vld [vmem:[%s5245_s4 + $0x560] sm:$0xff]  ;;  %v3574_v13 = vcombine.low %v391_v0, %v395_v1  ;;  %v448_v0 = vld [vmem:[%s5245_s4 + $0x6c8] sm:$0xff] }
  0x4a   :  { %v452_v1 = vld [vmem:[%s5245_s4 + $0x6e8] sm:$0xff] }
  0x4b   :  { %1798 = vmatpush1.bf16.msra.mxu0 %v3534_v7  ;;  %1880 = vmatpush1.bf16.msra.mxu1 %v3536_v8  ;;  %v3577_v7 = vcombine.high %v392_v2, %v396_v3  ;;  %v399_v8 = vld [vmem:[%s5245_s4 + $0x540] sm:$0xff] }
  0x4c   :  { %1808 = vmatprep.subr.bf16.mxu0 %v3543_v14  ;;  %1890 = vmatprep.subr.bf16.mxu1 %v3545_v18  ;;  %v3576_v14 = vcombine.low %v392_v2, %v396_v3  ;;  %v3583_v15 = vcombine.high %v399_v8, %v403_v10  ;;  %v411_v18 = vld [vmem:[%s5245_s4 + $0x5a0] sm:$0xff]  ;;  %v3582_v22 = vcombine.low %v399_v8, %v403_v10  ;;  %v456_v8 = vld [vmem:[%s5245_s4 + $0x708] sm:$0xff] }
  0x4d   :  { %v460_v10 = vld [vmem:[%s5245_s4 + $0x728] sm:$0xff] }
  0x88   :  { %v4178_v19 = vpop.permute.xlu0 %41 }
  0xd9   :  { %v86_v20 = vpop.f32.mrb[0].mxu0  ;;  %v131_v21 = vpop.f32.mrb[0].mxu1 }
  0xda   :  { %v87_v23 = vadd.f32 %v86_v20, %v4178_v19  ;;  %v132_v24 = vadd.f32 %v131_v21, %v4178_v19  ;;  %v3694_v25 = vpop.f32.mrb[1].mxu0  ;;  %v3700_v26 = vpop.f32.mrb[1].mxu1  ;;  %v408_v20 = vld [vmem:[%s5245_s4 + $0x588] sm:$0xff] }
  0xdb   :  { %v89_v30 = vpop.f32.mrb[2].mxu0  ;;  %v134_v31 = vpop.f32.mrb[2].mxu1  ;;  %v412_v21 = vld [vmem:[%s5245_s4 + $0x5a8] sm:$0xff]  ;;  %v415_v26 = vld [vmem:[%s5245_s4 + $0x5c0] sm:$0xff] }
  0xdc   :  { %v4194_v32 = vpack.c.bf16 %v87_v23, %v87_v23  ;;  %v4196_v33 = vpack.c.bf16 %v132_v24, %v132_v24  ;;  %v3695_v34 = vpop.f32.mrb[3].mxu0  ;;  %v3701_v35 = vpop.f32.mrb[3].mxu1  ;;  %v3584_v23 = vcombine.low %v400_v11, %v404_v12  ;;  %v3593_v25 = vcombine.high %v408_v20, %v412_v21 }
  0xdd   :  { %v3592_v31 = vcombine.low %v408_v20, %v412_v21  ;;  %v3599_v34 = vcombine.high %v415_v26, %v419_v27  ;;  %v3601_v35 = vcombine.high %v416_v28, %v420_v29  ;;  %v3598_v40 = vcombine.low %v415_v26, %v419_v27  ;;  %v472_v26 = vld [vmem:[%s5245_s4 + $0x788] sm:$0xff] }
  0xde   :  { %1799 = vmatprep.mubr.bf16.mxu0 %v4196_v33  ;;  %1881 = vmatprep.mubr.bf16.mxu1 %v4196_v33  ;;  %v3640_v21 = vcombine.low %v456_v8, %v460_v10  ;;  %v476_v27 = vld [vmem:[%s5245_s4 + $0x7a8] sm:$0xff] }
  0xdf   :  { %1800 = vmatmul.mubr.bf16.vlgmr.msra.gmra.mrb[8].mxu0 %v4194_v32  ;;  %1882 = vmatmul.mubr.bf16.vlgmr.msra.gmra.mrb[8].mxu1 %v4194_v32 }
  0xe0   :  { %1809 = vmatpush1.bf16.msra.mxu0 %v3542_v16  ;;  %1891 = vmatpush1.bf16.msra.mxu1 %v3544_v17  ;;  %v3585_v16 = vcombine.high %v400_v11, %v404_v12  ;;  %v407_v17 = vld [vmem:[%s5245_s4 + $0x580] sm:$0xff]  ;;  %v3632_v12 = vcombine.low %v448_v0, %v452_v1 }
  0xe1   :  { %v4214_v44 = vpop.f32.mrb[4].mxu0  ;;  %v221_v45 = vpop.f32.mrb[4].mxu1  ;;  %1810 = vmatprep.subr.bf16.mxu0 %v3551_v36  ;;  %1892 = vmatprep.subr.bf16.mxu1 %v3553_v37  ;;  %v3591_v24 = vcombine.high %v407_v17, %v411_v18  ;;  %v3590_v30 = vcombine.low %v407_v17, %v411_v18  ;;  %v423_v36 = vld [vmem:[%s5245_s4 + $0x600] sm:$0xff]  ;;  %v464_v17 = vld [vmem:[%s5245_s4 + $0x748] sm:$0xff] }
  0xe2   :  { %v222_v49 = vadd.f32 %v221_v45, %v4178_v19  ;;  %v3712_v53 = vpop.f32.mrb[5].mxu1  ;;  %v3706_v54 = vpop.f32.mrb[5].mxu0  ;;  %v427_v37 = vld [vmem:[%s5245_s4 + $0x620] sm:$0xff]  ;;  %v468_v18 = vld [vmem:[%s5245_s4 + $0x768] sm:$0xff] }
  0xe3   :  { %v224_v55 = vpop.f32.mrb[6].mxu1  ;;  %v179_v56 = vpop.f32.mrb[6].mxu0  ;;  %v431_v45 = vld [vmem:[%s5245_s4 + $0x640] sm:$0xff]  ;;  %v3648_v29 = vcombine.low %v464_v17, %v468_v18 }
  0xe4   :  { %v4229_v57 = vpack.c.bf16 %v222_v49, %v222_v49  ;;  %1811 = vmatpush1.bf16.msra.mxu0 %v3550_v42  ;;  %1893 = vmatpush1.bf16.msra.mxu1 %v3552_v43  ;;  %v3713_v60 = vpop.f32.mrb[7].mxu1  ;;  %v3707_v61 = vpop.f32.mrb[7].mxu0  ;;  %v3607_v42 = vcombine.high %v423_v36, %v427_v37  ;;  %v3609_v43 = vcombine.high %v424_v38, %v428_v39  ;;  %v439_v53 = vld [vmem:[%s5245_s4 + $0x680] sm:$0xff]  ;;  %v440_v55 = vld [vmem:[%s5245_s4 + $0x688] sm:$0xff] }
  0xe5   :  { %1812 = vmatprep.subr.bf16.mxu0 %v3559_v46  ;;  %1894 = vmatprep.subr.bf16.mxu1 %v3561_v47  ;;  %v435_v46 = vld [vmem:[%s5245_s4 + $0x660] sm:$0xff]  ;;  %v432_v47 = vld [vmem:[%s5245_s4 + $0x648] sm:$0xff]  ;;  %v3606_v49 = vcombine.low %v423_v36, %v427_v37  ;;  %v3656_v39 = vcombine.low %v472_v26, %v476_v27 }
  0xe6   :  { %1840 = vmatprep.mubr.bf16.mxu0 %v4229_v57  ;;  %1922 = vmatprep.mubr.bf16.mxu1 %v4229_v57  ;;  %v3615_v51 = vcombine.high %v431_v45, %v435_v46  ;;  %v3617_v52 = vcombine.high %v432_v47, %v436_v48  ;;  %v443_v54 = vld [vmem:[%s5245_s4 + $0x6a0] sm:$0xff]  ;;  %v444_v56 = vld [vmem:[%s5245_s4 + $0x6a8] sm:$0xff] }
  0xe7   :  { %v3623_v60 = vcombine.high %v439_v53, %v443_v54  ;;  %v3625_v61 = vcombine.high %v440_v55, %v444_v56  ;;  %v3622_v2 = vcombine.low %v439_v53, %v443_v54  ;;  %v3624_v3 = vcombine.low %v440_v55, %v444_v56  ;;  %v480_v36 = vld [vmem:[%s5245_s4 + $0x7c8] sm:$0xff]  ;;  %v245_v53 = vld [vmem:[%s5245_s4 + $0x70] sm:$0xff]  ;;  %v242_v54 = vld [vmem:[%s5245_s4 + $0x58] sm:$0xff] }
  0xe8   :  { %1813 = vmatpush1.bf16.msra.mxu0 %v3558_v58  ;;  %1895 = vmatpush1.bf16.msra.mxu1 %v3560_v59  ;;  %v3614_v58 = vcombine.low %v431_v45, %v435_v46  ;;  %v3616_v59 = vcombine.low %v432_v47, %v436_v48  ;;  %v484_v37 = vld [vmem:[%s5245_s4 + $0x7e8] sm:$0xff]  ;;  %v234_v45 = vld [vmem:[%s5245_s4 + $0x18] sm:$0xff] }
  0xe9   :  { %1814 = vmatprep.subr.bf16.mxu0 %v3567_v62  ;;  %1896 = vmatprep.subr.bf16.mxu1 %v3569_v63  ;;  %v447_v62 = vld [vmem:[%s5245_s4 + $0x6c0] sm:$0xff]  ;;  %v238_v46 = vld [vmem:[%s5245_s4 + $0x38] sm:$0xff]  ;;  %v3664_v48 = vcombine.low %v480_v36, %v484_v37 }
  0xea   :  { %v451_v63 = vld [vmem:[%s5245_s4 + $0x6e0] sm:$0xff]  ;;  %v3420_v56 = vcombine.low %v234_v45, %v238_v46 }
  0xeb   :  { %v3630_v11 = vcombine.low %v447_v62, %v451_v63 }
  0xec   :  { %1815 = vmatpush1.bf16.msra.mxu0 %v3566_v4  ;;  %1897 = vmatpush1.bf16.msra.mxu1 %v3568_v5  ;;  %v3631_v4 = vcombine.high %v447_v62, %v451_v63  ;;  %v3633_v5 = vcombine.high %v448_v0, %v452_v1  ;;  %v250_v62 = vld [vmem:[%s5245_s4 + $0x98] sm:$0xff] }
  0xed   :  { %1816 = vmatprep.subr.bf16.mxu0 %v3575_v6  ;;  %1898 = vmatprep.subr.bf16.mxu1 %v3577_v7  ;;  %v455_v6 = vld [vmem:[%s5245_s4 + $0x700] sm:$0xff]  ;;  %v254_v63 = vld [vmem:[%s5245_s4 + $0xb8] sm:$0xff] }
  0xee   :  { %v459_v7 = vld [vmem:[%s5245_s4 + $0x720] sm:$0xff] }
  0xef   :  { %v3638_v20 = vcombine.low %v455_v6, %v459_v7 }
  0xf0   :  { %1817 = vmatpush1.bf16.msra.mxu0 %v3574_v13  ;;  %1899 = vmatpush1.bf16.msra.mxu1 %v3576_v14  ;;  %v3639_v13 = vcombine.high %v455_v6, %v459_v7  ;;  %v3641_v14 = vcombine.high %v456_v8, %v460_v10  ;;  %v258_v6 = vld [vmem:[%s5245_s4 + $0xd8] sm:$0xff]  ;;  %v3436_v8 = vcombine.low %v250_v62, %v254_v63 }
  0xf1   :  { %1818 = vmatprep.subr.bf16.mxu0 %v3583_v15  ;;  %1900 = vmatprep.subr.bf16.mxu1 %v3585_v16  ;;  %v463_v15 = vld [vmem:[%s5245_s4 + $0x740] sm:$0xff] }
  0xf2   :  { %v467_v16 = vld [vmem:[%s5245_s4 + $0x760] sm:$0xff] }
  0xf3   :  { %v3646_v28 = vcombine.low %v463_v15, %v467_v16 }
  0xf4   :  { %1819 = vmatpush1.bf16.msra.mxu0 %v3582_v22  ;;  %1901 = vmatpush1.bf16.msra.mxu1 %v3584_v23  ;;  %v3647_v22 = vcombine.high %v463_v15, %v467_v16  ;;  %v3649_v23 = vcombine.high %v464_v17, %v468_v18  ;;  %v270_v15 = vld [vmem:[%s5245_s4 + $0x138] sm:$0xff] }
  0xf5   :  { %1820 = vmatprep.subr.bf16.mxu0 %v3591_v24  ;;  %1902 = vmatprep.subr.bf16.mxu1 %v3593_v25  ;;  %v471_v24 = vld [vmem:[%s5245_s4 + $0x780] sm:$0xff] }
  0xf6   :  { %v475_v25 = vld [vmem:[%s5245_s4 + $0x7a0] sm:$0xff] }
  0xf7   :  { %v3654_v38 = vcombine.low %v471_v24, %v475_v25 }
  0xf8   :  { %1821 = vmatpush1.bf16.msra.mxu0 %v3590_v30  ;;  %1903 = vmatpush1.bf16.msra.mxu1 %v3592_v31  ;;  %v3655_v30 = vcombine.high %v471_v24, %v475_v25  ;;  %v3657_v31 = vcombine.high %v472_v26, %v476_v27  ;;  %v278_v24 = vld [vmem:[%s5245_s4 + $0x178] sm:$0xff] }
  0xf9   :  { %1822 = vmatprep.subr.bf16.mxu0 %v3599_v34  ;;  %1904 = vmatprep.subr.bf16.mxu1 %v3601_v35  ;;  %v479_v34 = vld [vmem:[%s5245_s4 + $0x7c0] sm:$0xff] }
  0xfa   :  { %v483_v35 = vld [vmem:[%s5245_s4 + $0x7e0] sm:$0xff] }
  0xfb   :  { %v3662_v47 = vcombine.low %v479_v34, %v483_v35 }
  0xfc   :  { %1823 = vmatpush1.bf16.msra.mxu0 %v3598_v40  ;;  %1905 = vmatpush1.bf16.msra.mxu1 %v3600_v41  ;;  %v3663_v40 = vcombine.high %v479_v34, %v483_v35  ;;  %v3665_v41 = vcombine.high %v480_v36, %v484_v37  ;;  %v286_v34 = vld [vmem:[%s5245_s4 + $0x1b8] sm:$0xff] }
  0xfd   :  { %1824 = vmatprep.subr.bf16.mxu0 %v3607_v42  ;;  %1906 = vmatprep.subr.bf16.mxu1 %v3609_v43  ;;  %v233_v42 = vld [vmem:[%s5245_s4 + $0x10] sm:$0xff] }
  0xfe   :  { %v237_v43 = vld [vmem:[%s5245_s4 + $0x30] sm:$0xff] }
 0x100   :  { %1825 = vmatpush1.bf16.msra.mxu0 %v3606_v49  ;;  %1907 = vmatpush1.bf16.msra.mxu1 %v3608_v50  ;;  %v177_v49 = vadd.f32 %v4214_v44, %v4178_v19  ;;  %v3419_v50 = vcombine.high %v233_v42, %v237_v43  ;;  %v246_v19 = vld [vmem:[%s5245_s4 + $0x78] sm:$0xff]  ;;  %v3418_v44 = vcombine.low %v233_v42, %v237_v43 }
 0x101   :  { %1826 = vmatprep.subr.bf16.mxu0 %v3615_v51  ;;  %1908 = vmatprep.subr.bf16.mxu1 %v3617_v52  ;;  %v3421_v51 = vcombine.high %v234_v45, %v238_v46  ;;  %v241_v52 = vld [vmem:[%s5245_s4 + $0x50] sm:$0xff]  ;;  %v3428_v1 = vcombine.low %v242_v54, %v246_v19  ;;  %v294_v42 = vld [vmem:[%s5245_s4 + $0x1f8] sm:$0xff] }
 0x102   :  { %v4403_v55 = vpack.c.bf16 %v177_v49, %v177_v49  ;;  %v3426_v0 = vcombine.low %v241_v52, %v245_v53  ;;  %v301_v49 = vld [vmem:[%s5245_s4 + $0x230] sm:$0xff] }
 0x104   :  { %1827 = vmatpush1.bf16.msra.mxu0 %v3614_v58  ;;  %1909 = vmatpush1.bf16.msra.mxu1 %v3616_v59  ;;  %v3427_v58 = vcombine.high %v241_v52, %v245_v53  ;;  %v3429_v59 = vcombine.high %v242_v54, %v246_v19 }
 0x105   :  { %1828 = vmatprep.subr.bf16.mxu0 %v3623_v60  ;;  %1910 = vmatprep.subr.bf16.mxu1 %v3625_v61  ;;  %v249_v60 = vld [vmem:[%s5245_s4 + $0x90] sm:$0xff] }
 0x106   :  { %v253_v61 = vld [vmem:[%s5245_s4 + $0xb0] sm:$0xff] }
 0x107   :  { %v3434_v7 = vcombine.low %v249_v60, %v253_v61 }
 0x108   :  { %1829 = vmatpush1.bf16.msra.mxu0 %v3622_v2  ;;  %1911 = vmatpush1.bf16.msra.mxu1 %v3624_v3  ;;  %v3435_v2 = vcombine.high %v249_v60, %v253_v61  ;;  %v3437_v3 = vcombine.high %v250_v62, %v254_v63 }
 0x109   :  { %1830 = vmatprep.subr.bf16.mxu0 %v3631_v4  ;;  %1912 = vmatprep.subr.bf16.mxu1 %v3633_v5  ;;  %v257_v4 = vld [vmem:[%s5245_s4 + $0xd0] sm:$0xff] }
 0x10a   :  { %v261_v5 = vld [vmem:[%s5245_s4 + $0xf0] sm:$0xff] }
 0x10b   :  { %v3443_v10 = vcombine.high %v257_v4, %v261_v5  ;;  %v3442_v16 = vcombine.low %v257_v4, %v261_v5 }
 0x10c   :  { %1831 = vmatpush1.bf16.msra.mxu0 %v3630_v11  ;;  %1913 = vmatpush1.bf16.msra.mxu1 %v3632_v12  ;;  %v265_v12 = vld [vmem:[%s5245_s4 + $0x110] sm:$0xff] }
 0x10d   :  { %1832 = vmatprep.subr.bf16.mxu0 %v3639_v13  ;;  %1914 = vmatprep.subr.bf16.mxu1 %v3641_v14  ;;  %v269_v13 = vld [vmem:[%s5245_s4 + $0x130] sm:$0xff]  ;;  %v266_v14 = vld [vmem:[%s5245_s4 + $0x118] sm:$0xff] }
 0x10e   :  { %v3451_v18 = vcombine.high %v265_v12, %v269_v13  ;;  %v3450_v25 = vcombine.low %v265_v12, %v269_v13  ;;  %v3452_v26 = vcombine.low %v266_v14, %v270_v15 }
 0x110   :  { %1833 = vmatpush1.bf16.msra.mxu0 %v3638_v20  ;;  %1915 = vmatpush1.bf16.msra.mxu1 %v3640_v21  ;;  %v3453_v20 = vcombine.high %v266_v14, %v270_v15  ;;  %v273_v21 = vld [vmem:[%s5245_s4 + $0x150] sm:$0xff] }
 0x111   :  { %1834 = vmatprep.subr.bf16.mxu0 %v3647_v22  ;;  %1916 = vmatprep.subr.bf16.mxu1 %v3649_v23  ;;  %v277_v22 = vld [vmem:[%s5245_s4 + $0x170] sm:$0xff]  ;;  %v274_v23 = vld [vmem:[%s5245_s4 + $0x158] sm:$0xff] }
 0x112   :  { %v3459_v27 = vcombine.high %v273_v21, %v277_v22  ;;  %v3458_v35 = vcombine.low %v273_v21, %v277_v22  ;;  %v3460_v36 = vcombine.low %v274_v23, %v278_v24 }
 0x114   :  { %1835 = vmatpush1.bf16.msra.mxu0 %v3646_v28  ;;  %1917 = vmatpush1.bf16.msra.mxu1 %v3648_v29  ;;  %v3461_v28 = vcombine.high %v274_v23, %v278_v24  ;;  %v281_v29 = vld [vmem:[%s5245_s4 + $0x190] sm:$0xff] }
 0x115   :  { %1836 = vmatprep.subr.bf16.mxu0 %v3655_v30  ;;  %1918 = vmatprep.subr.bf16.mxu1 %v3657_v31  ;;  %v285_v30 = vld [vmem:[%s5245_s4 + $0x1b0] sm:$0xff]  ;;  %v282_v31 = vld [vmem:[%s5245_s4 + $0x198] sm:$0xff] }
 0x116   :  { %v3467_v37 = vcombine.high %v281_v29, %v285_v30  ;;  %v3466_v43 = vcombine.low %v281_v29, %v285_v30  ;;  %v3468_v45 = vcombine.low %v282_v31, %v286_v34 }
 0x118   :  { %1837 = vmatpush1.bf16.msra.mxu0 %v3654_v38  ;;  %1919 = vmatpush1.bf16.msra.mxu1 %v3656_v39  ;;  %v3469_v38 = vcombine.high %v282_v31, %v286_v34  ;;  %v289_v39 = vld [vmem:[%s5245_s4 + $0x1d0] sm:$0xff] }
 0x119   :  { %1838 = vmatprep.subr.bf16.mxu0 %v3663_v40  ;;  %1920 = vmatprep.subr.bf16.mxu1 %v3665_v41  ;;  %v293_v40 = vld [vmem:[%s5245_s4 + $0x1f0] sm:$0xff]  ;;  %v290_v41 = vld [vmem:[%s5245_s4 + $0x1d8] sm:$0xff] }
 0x11a   :  { %v3475_v46 = vcombine.high %v289_v39, %v293_v40  ;;  %v3474_v52 = vcombine.low %v289_v39, %v293_v40  ;;  %v3476_v53 = vcombine.low %v290_v41, %v294_v42 }
 0x11c   :  { %1839 = vmatpush1.bf16.msra.mxu0 %v3662_v47  ;;  %1921 = vmatpush1.bf16.msra.mxu1 %v3664_v48  ;;  %v3477_v47 = vcombine.high %v290_v41, %v294_v42  ;;  %v297_v48 = vld [vmem:[%s5245_s4 + $0x210] sm:$0xff] }
 0x11d   :  { %1931 = vmatprep.subr.bf16.mxu0 %v3419_v50  ;;  %2013 = vmatprep.subr.bf16.mxu1 %v3421_v51  ;;  %v298_v50 = vld [vmem:[%s5245_s4 + $0x218] sm:$0xff]  ;;  %v3483_v54 = vcombine.high %v297_v48, %v301_v49  ;;  %v3482_v60 = vcombine.low %v297_v48, %v301_v49 }
 0x11e   :  { %v302_v51 = vld [vmem:[%s5245_s4 + $0x238] sm:$0xff] }
 0x11f   :  { %1841 = vmatmul.mubr.bf16.vlgmr.msra.gmra.mrb[8].mxu0 %v4403_v55  ;;  %1923 = vmatmul.mubr.bf16.vlgmr.msra.gmra.mrb[8].mxu1 %v4403_v55  ;;  %v3485_v19 = vcombine.high %v298_v50, %v302_v51  ;;  %v3484_v61 = vcombine.low %v298_v50, %v302_v51 }
 0x120   :  { %1932 = vmatpush1.bf16.msra.mxu0 %v3418_v44  ;;  %1963 = vmatprep.mubr.bf16.mxu0 %v4196_v33  ;;  %v305_v44 = vld [vmem:[%s5245_s4 + $0x250] sm:$0xff] }
 0x121   :  { %2014 = vmatpush1.bf16.msra.mxu1 %v3420_v56  ;;  %2045 = vmatprep.mubr.bf16.mxu1 %v4196_v33  ;;  %v262_v33 = vld [vmem:[%s5245_s4 + $0xf8] sm:$0xff]  ;;  %v309_v56 = vld [vmem:[%s5245_s4 + $0x270] sm:$0xff] }
 0x122   :  { %1933 = vmatprep.subr.bf16.mxu0 %v3427_v58  ;;  %2015 = vmatprep.subr.bf16.mxu1 %v3429_v59  ;;  %v3445_v11 = vcombine.high %v258_v6, %v262_v33  ;;  %v3444_v17 = vcombine.low %v258_v6, %v262_v33  ;;  %v306_v58 = vld [vmem:[%s5245_s4 + $0x258] sm:$0xff]  ;;  %v3491_v62 = vcombine.high %v305_v44, %v309_v56 }
 0x123   :  { %v310_v59 = vld [vmem:[%s5245_s4 + $0x278] sm:$0xff]  ;;  %v3490_v4 = vcombine.low %v305_v44, %v309_v56 }
 0x124   :  { %1934 = vmatpush1.bf16.msra.mxu0 %v3426_v0  ;;  %v3493_v63 = vcombine.high %v306_v58, %v310_v59  ;;  %v313_v0 = vld [vmem:[%s5245_s4 + $0x290] sm:$0xff]  ;;  %v3492_v5 = vcombine.low %v306_v58, %v310_v59 }
 0x125   :  { %2016 = vmatpush1.bf16.msra.mxu1 %v3428_v1  ;;  %1935 = vmatprep.subr.bf16.mxu0 %v3435_v2  ;;  %v317_v1 = vld [vmem:[%s5245_s4 + $0x2b0] sm:$0xff]  ;;  %v314_v2 = vld [vmem:[%s5245_s4 + $0x298] sm:$0xff] }
 0x126   :  { %2017 = vmatprep.subr.bf16.mxu1 %v3437_v3  ;;  %v318_v3 = vld [vmem:[%s5245_s4 + $0x2b8] sm:$0xff]  ;;  %v3499_v6 = vcombine.high %v313_v0, %v317_v1  ;;  %v3498_v12 = vcombine.low %v313_v0, %v317_v1 }
 0x127   :  { %v3501_v33 = vcombine.high %v314_v2, %v318_v3  ;;  %v3500_v13 = vcombine.low %v314_v2, %v318_v3  ;;  %v374_v0 = vld [vmem:[%s5245_s4 + $0x478] sm:$0xff]  ;;  %v377_v3 = vld [vmem:[%s5245_s4 + $0x490] sm:$0xff] }
 0x128   :  { %1936 = vmatpush1.bf16.msra.mxu0 %v3434_v7  ;;  %v321_v7 = vld [vmem:[%s5245_s4 + $0x2d0] sm:$0xff] }
 0x129   :  { %2018 = vmatpush1.bf16.msra.mxu1 %v3436_v8  ;;  %1937 = vmatprep.subr.bf16.mxu0 %v3443_v10  ;;  %v325_v8 = vld [vmem:[%s5245_s4 + $0x2f0] sm:$0xff]  ;;  %v322_v10 = vld [vmem:[%s5245_s4 + $0x2d8] sm:$0xff] }
 0x12a   :  { %2019 = vmatprep.subr.bf16.mxu1 %v3445_v11  ;;  %v326_v11 = vld [vmem:[%s5245_s4 + $0x2f8] sm:$0xff]  ;;  %v3507_v14 = vcombine.high %v321_v7, %v325_v8  ;;  %v3506_v21 = vcombine.low %v321_v7, %v325_v8 }
 0x12b   :  { %v3509_v15 = vcombine.high %v322_v10, %v326_v11  ;;  %v3508_v22 = vcombine.low %v322_v10, %v326_v11 }
 0x12c   :  { %1938 = vmatpush1.bf16.msra.mxu0 %v3442_v16  ;;  %v329_v16 = vld [vmem:[%s5245_s4 + $0x310] sm:$0xff] }
 0x12d   :  { %2020 = vmatpush1.bf16.msra.mxu1 %v3444_v17  ;;  %1939 = vmatprep.subr.bf16.mxu0 %v3451_v18  ;;  %v333_v17 = vld [vmem:[%s5245_s4 + $0x330] sm:$0xff]  ;;  %v330_v18 = vld [vmem:[%s5245_s4 + $0x318] sm:$0xff] }
 0x12e   :  { %2021 = vmatprep.subr.bf16.mxu1 %v3453_v20  ;;  %v334_v20 = vld [vmem:[%s5245_s4 + $0x338] sm:$0xff]  ;;  %v3515_v23 = vcombine.high %v329_v16, %v333_v17  ;;  %v3514_v29 = vcombine.low %v329_v16, %v333_v17 }
 0x12f   :  { %v3517_v24 = vcombine.high %v330_v18, %v334_v20  ;;  %v3516_v30 = vcombine.low %v330_v18, %v334_v20  ;;  %v393_v18 = vld [vmem:[%s5245_s4 + $0x510] sm:$0xff] }
 0x130   :  { %1940 = vmatpush1.bf16.msra.mxu0 %v3450_v25  ;;  %v337_v25 = vld [vmem:[%s5245_s4 + $0x350] sm:$0xff] }
 0x131   :  { %2022 = vmatpush1.bf16.msra.mxu1 %v3452_v26  ;;  %1941 = vmatprep.subr.bf16.mxu0 %v3459_v27  ;;  %v341_v26 = vld [vmem:[%s5245_s4 + $0x370] sm:$0xff]  ;;  %v338_v27 = vld [vmem:[%s5245_s4 + $0x358] sm:$0xff] }
 0x132   :  { %2023 = vmatprep.subr.bf16.mxu1 %v3461_v28  ;;  %v342_v28 = vld [vmem:[%s5245_s4 + $0x378] sm:$0xff]  ;;  %v3523_v31 = vcombine.high %v337_v25, %v341_v26  ;;  %v3522_v39 = vcombine.low %v337_v25, %v341_v26  ;;  %v397_v20 = vld [vmem:[%s5245_s4 + $0x530] sm:$0xff] }
 0x133   :  { %v3525_v34 = vcombine.high %v338_v27, %v342_v28  ;;  %v3524_v40 = vcombine.low %v338_v27, %v342_v28  ;;  %v3579_v25 = vcombine.high %v393_v18, %v397_v20  ;;  %v401_v27 = vld [vmem:[%s5245_s4 + $0x550] sm:$0xff] }
 0x134   :  { %1942 = vmatpush1.bf16.msra.mxu0 %v3458_v35  ;;  %v345_v35 = vld [vmem:[%s5245_s4 + $0x390] sm:$0xff] }
 0x135   :  { %2024 = vmatpush1.bf16.msra.mxu1 %v3460_v36  ;;  %1943 = vmatprep.subr.bf16.mxu0 %v3467_v37  ;;  %v349_v36 = vld [vmem:[%s5245_s4 + $0x3b0] sm:$0xff]  ;;  %v346_v37 = vld [vmem:[%s5245_s4 + $0x398] sm:$0xff] }
 0x136   :  { %2025 = vmatprep.subr.bf16.mxu1 %v3469_v38  ;;  %v350_v38 = vld [vmem:[%s5245_s4 + $0x3b8] sm:$0xff]  ;;  %v3531_v41 = vcombine.high %v345_v35, %v349_v36  ;;  %v3530_v48 = vcombine.low %v345_v35, %v349_v36  ;;  %v405_v28 = vld [vmem:[%s5245_s4 + $0x570] sm:$0xff] }
 0x137   :  { %v3533_v42 = vcombine.high %v346_v37, %v350_v38  ;;  %v3532_v49 = vcombine.low %v346_v37, %v350_v38  ;;  %v3587_v35 = vcombine.high %v401_v27, %v405_v28  ;;  %v409_v37 = vld [vmem:[%s5245_s4 + $0x590] sm:$0xff] }
 0x138   :  { %1944 = vmatpush1.bf16.msra.mxu0 %v3466_v43  ;;  %v353_v43 = vld [vmem:[%s5245_s4 + $0x3d0] sm:$0xff] }
 0x139   :  { %2026 = vmatpush1.bf16.msra.mxu1 %v3468_v45  ;;  %1945 = vmatprep.subr.bf16.mxu0 %v3475_v46  ;;  %v357_v45 = vld [vmem:[%s5245_s4 + $0x3f0] sm:$0xff]  ;;  %v354_v46 = vld [vmem:[%s5245_s4 + $0x3d8] sm:$0xff] }
 0x13a   :  { %2027 = vmatprep.subr.bf16.mxu1 %v3477_v47  ;;  %v358_v47 = vld [vmem:[%s5245_s4 + $0x3f8] sm:$0xff]  ;;  %v3539_v50 = vcombine.high %v353_v43, %v357_v45  ;;  %v3538_v44 = vcombine.low %v353_v43, %v357_v45  ;;  %v413_v38 = vld [vmem:[%s5245_s4 + $0x5b0] sm:$0xff] }
 0x13b   :  { %v3541_v51 = vcombine.high %v354_v46, %v358_v47  ;;  %v3540_v56 = vcombine.low %v354_v46, %v358_v47  ;;  %v3595_v45 = vcombine.high %v409_v37, %v413_v38 }
 0x13c   :  { %1946 = vmatpush1.bf16.msra.mxu0 %v3474_v52  ;;  %v361_v52 = vld [vmem:[%s5245_s4 + $0x410] sm:$0xff] }
 0x13d   :  { %2028 = vmatpush1.bf16.msra.mxu1 %v3476_v53  ;;  %1947 = vmatprep.subr.bf16.mxu0 %v3483_v54  ;;  %v365_v53 = vld [vmem:[%s5245_s4 + $0x430] sm:$0xff]  ;;  %v362_v54 = vld [vmem:[%s5245_s4 + $0x418] sm:$0xff] }
 0x13e   :  { %2029 = vmatprep.subr.bf16.mxu1 %v3485_v19  ;;  %v366_v19 = vld [vmem:[%s5245_s4 + $0x438] sm:$0xff]  ;;  %v3547_v58 = vcombine.high %v361_v52, %v365_v53 }
 0x13f   :  { %v3549_v59 = vcombine.high %v362_v54, %v366_v19  ;;  %v3548_v1 = vcombine.low %v362_v54, %v366_v19  ;;  %v3594_v19 = vcombine.low %v409_v37, %v413_v38  ;;  %v469_v37 = vld [vmem:[%s5245_s4 + $0x770] sm:$0xff]  ;;  %v466_v38 = vld [vmem:[%s5245_s4 + $0x758] sm:$0xff] }
 0x140   :  { %1948 = vmatpush1.bf16.msra.mxu0 %v3482_v60  ;;  %v369_v60 = vld [vmem:[%s5245_s4 + $0x450] sm:$0xff] }
 0x141   :  { %2030 = vmatpush1.bf16.msra.mxu1 %v3484_v61  ;;  %1949 = vmatprep.subr.bf16.mxu0 %v3491_v62  ;;  %v373_v61 = vld [vmem:[%s5245_s4 + $0x470] sm:$0xff]  ;;  %v3546_v62 = vcombine.low %v361_v52, %v365_v53  ;;  %v422_v52 = vld [vmem:[%s5245_s4 + $0x5f8] sm:$0xff] }
 0x142   :  { %2031 = vmatprep.subr.bf16.mxu1 %v3493_v63  ;;  %v370_v63 = vld [vmem:[%s5245_s4 + $0x458] sm:$0xff]  ;;  %v3555_v2 = vcombine.high %v369_v60, %v373_v61  ;;  %v3554_v7 = vcombine.low %v369_v60, %v373_v61  ;;  %v429_v60 = vld [vmem:[%s5245_s4 + $0x630] sm:$0xff] }
 0x143   :  { %v3556_v8 = vcombine.low %v370_v63, %v374_v0  ;;  %v426_v61 = vld [vmem:[%s5245_s4 + $0x618] sm:$0xff] }
 0x144   :  { %1950 = vmatpush1.bf16.msra.mxu0 %v3490_v4  ;;  %v381_v4 = vld [vmem:[%s5245_s4 + $0x4b0] sm:$0xff] }
 0x145   :  { %2032 = vmatpush1.bf16.msra.mxu1 %v3492_v5  ;;  %1951 = vmatprep.subr.bf16.mxu0 %v3499_v6  ;;  %v3557_v5 = vcombine.high %v370_v63, %v374_v0  ;;  %v378_v6 = vld [vmem:[%s5245_s4 + $0x498] sm:$0xff]  ;;  %v3563_v10 = vcombine.high %v377_v3, %v381_v4 }
 0x146   :  { %2033 = vmatprep.subr.bf16.mxu1 %v3501_v33  ;;  %v382_v33 = vld [vmem:[%s5245_s4 + $0x4b8] sm:$0xff] }
 0x147   :  { %v3565_v11 = vcombine.high %v378_v6, %v382_v33 }
 0x148   :  { %1952 = vmatpush1.bf16.msra.mxu0 %v3498_v12  ;;  %v385_v12 = vld [vmem:[%s5245_s4 + $0x4d0] sm:$0xff] }
 0x149   :  { %2034 = vmatpush1.bf16.msra.mxu1 %v3500_v13  ;;  %1953 = vmatprep.subr.bf16.mxu0 %v3507_v14  ;;  %v389_v13 = vld [vmem:[%s5245_s4 + $0x4f0] sm:$0xff]  ;;  %v390_v14 = vld [vmem:[%s5245_s4 + $0x4f8] sm:$0xff] }
 0x14a   :  { %2035 = vmatprep.subr.bf16.mxu1 %v3509_v15  ;;  %v3564_v15 = vcombine.low %v378_v6, %v382_v33  ;;  %v3571_v16 = vcombine.high %v385_v12, %v389_v13  ;;  %v438_v6 = vld [vmem:[%s5245_s4 + $0x678] sm:$0xff] }
 0x14c   :  { %1954 = vmatpush1.bf16.msra.mxu0 %v3506_v21  ;;  %v394_v21 = vld [vmem:[%s5245_s4 + $0x518] sm:$0xff] }
 0x14d   :  { %2036 = vmatpush1.bf16.msra.mxu1 %v3508_v22  ;;  %1955 = vmatprep.subr.bf16.mxu0 %v3515_v23  ;;  %v398_v22 = vld [vmem:[%s5245_s4 + $0x538] sm:$0xff]  ;;  %v3570_v23 = vcombine.low %v385_v12, %v389_v13  ;;  %v445_v12 = vld [vmem:[%s5245_s4 + $0x6b0] sm:$0xff] }
 0x14e   :  { %2037 = vmatprep.subr.bf16.mxu1 %v3517_v24  ;;  %v3581_v26 = vcombine.high %v394_v21, %v398_v22  ;;  %v442_v13 = vld [vmem:[%s5245_s4 + $0x698] sm:$0xff] }
 0x150   :  { %1956 = vmatpush1.bf16.msra.mxu0 %v3514_v29  ;;  %v402_v29 = vld [vmem:[%s5245_s4 + $0x558] sm:$0xff] }
 0x151   :  { %2038 = vmatpush1.bf16.msra.mxu1 %v3516_v30  ;;  %1957 = vmatprep.subr.bf16.mxu0 %v3523_v31  ;;  %v406_v30 = vld [vmem:[%s5245_s4 + $0x578] sm:$0xff]  ;;  %v3578_v31 = vcombine.low %v393_v18, %v397_v20  ;;  %v453_v18 = vld [vmem:[%s5245_s4 + $0x6f0] sm:$0xff] }
 0x152   :  { %2039 = vmatprep.subr.bf16.mxu1 %v3525_v34  ;;  %v3580_v34 = vcombine.low %v394_v21, %v398_v22  ;;  %v3589_v36 = vcombine.high %v402_v29, %v406_v30  ;;  %v3588_v43 = vcombine.low %v402_v29, %v406_v30  ;;  %v450_v20 = vld [vmem:[%s5245_s4 + $0x6d8] sm:$0xff] }
 0x153   :  { %v454_v21 = vld [vmem:[%s5245_s4 + $0x6f8] sm:$0xff] }
 0x154   :  { %1958 = vmatpush1.bf16.msra.mxu0 %v3522_v39  ;;  %v410_v39 = vld [vmem:[%s5245_s4 + $0x598] sm:$0xff] }
 0x155   :  { %2040 = vmatpush1.bf16.msra.mxu1 %v3524_v40  ;;  %1959 = vmatprep.subr.bf16.mxu0 %v3531_v41  ;;  %v414_v40 = vld [vmem:[%s5245_s4 + $0x5b8] sm:$0xff]  ;;  %v3586_v41 = vcombine.low %v401_v27, %v405_v28  ;;  %v461_v27 = vld [vmem:[%s5245_s4 + $0x730] sm:$0xff] }
 0x156   :  { %2041 = vmatprep.subr.bf16.mxu1 %v3533_v42  ;;  %v2103_v42 = vld [vmem:[%s5247_s1] sm:$0xff]  ;;  %v458_v28 = vld [vmem:[%s5245_s4 + $0x718] sm:$0xff] }
 0x157   :  { %v2105_v46 = vunpack.c.l.bf16 %v2103_v42  ;;  %v2106_v47 = vunpack.c.h.bf16 %v2103_v42  ;;  %v462_v29 = vld [vmem:[%s5245_s4 + $0x738] sm:$0xff] }
 0x158   :  { %1960 = vmatpush1.bf16.msra.mxu0 %v3530_v48  ;;  %v3597_v48 = vcombine.high %v410_v39, %v414_v40 }
 0x159   :  { %2042 = vmatpush1.bf16.msra.mxu1 %v3532_v49  ;;  %1961 = vmatprep.subr.bf16.mxu0 %v3539_v50  ;;  %v417_v49 = vld [vmem:[%s5245_s4 + $0x5d0] sm:$0xff]  ;;  %v2114_v53 = vcombine.low %v2106_v47, %v2106_v47  ;;  %2122 = vst [vmem:[#allocation2 + $0x8] sm:$0xf0] %v2105_v46  ;;  %2124 = vst [vmem:[#allocation2 + $0x18] sm:$0xf0] %v2106_v47  ;;  %v2113_v54 = vcombine.low %v2105_v46, %v2105_v46  ;;  %v474_v47 = vld [vmem:[%s5245_s4 + $0x798] sm:$0xff] }
 0x15a   :  { %2043 = vmatprep.subr.bf16.mxu1 %v3541_v51  ;;  %v421_v50 = vld [vmem:[%s5245_s4 + $0x5f0] sm:$0xff]  ;;  %v418_v51 = vld [vmem:[%s5245_s4 + $0x5d8] sm:$0xff] }
 0x15b   :  { %2123 = vst [vmem:[#allocation2 + $0x10] sm:$0xf0] %v2114_v53  ;;  %2121 = vst [vmem:[#allocation2] sm:$0xf0] %v2113_v54  ;;  %v3602_v63 = vcombine.low %v417_v49, %v421_v50  ;;  %v3604_v0 = vcombine.low %v418_v51, %v422_v52  ;;  %v477_v46 = vld [vmem:[%s5245_s4 + $0x7b0] sm:$0xff] }
 0x15c   :  { %1962 = vmatpush1.bf16.msra.mxu0 %v3538_v44  ;;  %v3596_v44 = vcombine.low %v410_v39, %v414_v40  ;;  %v470_v39 = vld [vmem:[%s5245_s4 + $0x778] sm:$0xff]  ;;  %v481_v53 = vld [vmem:[%s5245_s4 + $0x7d0] sm:$0xff] }
 0x15d   :  { %2044 = vmatpush1.bf16.msra.mxu1 %v3540_v56  ;;  %1972 = vmatprep.subr.bf16.mxu0 %v3547_v58  ;;  %v3603_v56 = vcombine.high %v417_v49, %v421_v50  ;;  %v3605_v58 = vcombine.high %v418_v51, %v422_v52  ;;  %v3652_v50 = vcombine.low %v466_v38, %v470_v39  ;;  %v485_v54 = vld [vmem:[%s5245_s4 + $0x7f0] sm:$0xff] }
 0x15e   :  { %2054 = vmatprep.subr.bf16.mxu1 %v3549_v59  ;;  %v425_v59 = vld [vmem:[%s5245_s4 + $0x610] sm:$0xff] }
 0x15f   :  { %1964 = vmatmul.mubr.bf16.vlgmr.msra.gmra.mrb[12].mxu0 %v4194_v32  ;;  %v3610_v33 = vcombine.low %v425_v59, %v429_v60 }
 0x160   :  { %2046 = vmatmul.mubr.bf16.vlgmr.msra.gmra.mrb[12].mxu1 %v4194_v32  ;;  %1973 = vmatpush1.bf16.msra.mxu0 %v3546_v62  ;;  %v386_v32 = vld [vmem:[%s5245_s4 + $0x4d8] sm:$0xff] }
 0x161   :  { %2004 = vmatprep.mubr.bf16.mxu0 %v4229_v57  ;;  %2055 = vmatpush1.bf16.msra.mxu1 %v3548_v1  ;;  %v3573_v17 = vcombine.high %v386_v32, %v390_v14  ;;  %v3572_v24 = vcombine.low %v386_v32, %v390_v14  ;;  %v430_v62 = vld [vmem:[%s5245_s4 + $0x638] sm:$0xff]  ;;  %v3611_v1 = vcombine.high %v425_v59, %v429_v60 }
 0x162   :  { %2086 = vmatprep.mubr.bf16.mxu1 %v4229_v57  ;;  %1974 = vmatprep.subr.bf16.mxu0 %v3555_v2  ;;  %v3562_v57 = vcombine.low %v377_v3, %v381_v4  ;;  %v3613_v2 = vcombine.high %v426_v61, %v430_v62  ;;  %v433_v3 = vld [vmem:[%s5245_s4 + $0x650] sm:$0xff]  ;;  %v446_v32 = vld [vmem:[%s5245_s4 + $0x6b8] sm:$0xff]  ;;  %v3667_v59 = vcombine.high %v481_v53, %v485_v54 }
 0x163   :  { %2056 = vmatprep.subr.bf16.mxu1 %v3557_v5  ;;  %v437_v4 = vld [vmem:[%s5245_s4 + $0x670] sm:$0xff]  ;;  %v434_v5 = vld [vmem:[%s5245_s4 + $0x658] sm:$0xff] }
 0x164   :  { %1975 = vmatpush1.bf16.msra.mxu0 %v3554_v7  ;;  %v3612_v7 = vcombine.low %v426_v61, %v430_v62  ;;  %v3618_v14 = vcombine.low %v433_v3, %v437_v4  ;;  %v3666_v61 = vcombine.low %v481_v53, %v485_v54 }
 0x165   :  { %2057 = vmatpush1.bf16.msra.mxu1 %v3556_v8  ;;  %1976 = vmatprep.subr.bf16.mxu0 %v3563_v10  ;;  %v3619_v8 = vcombine.high %v433_v3, %v437_v4  ;;  %v3621_v10 = vcombine.high %v434_v5, %v438_v6 }
 0x166   :  { %2058 = vmatprep.subr.bf16.mxu1 %v3565_v11  ;;  %v441_v11 = vld [vmem:[%s5245_s4 + $0x690] sm:$0xff] }
 0x167   :  { %v3626_v22 = vcombine.low %v441_v11, %v445_v12 }
 0x168   :  { %1977 = vmatpush1.bf16.msra.mxu0 %v3562_v57  ;;  %v3620_v57 = vcombine.low %v434_v5, %v438_v6 }
 0x169   :  { %2059 = vmatpush1.bf16.msra.mxu1 %v3564_v15  ;;  %1978 = vmatprep.subr.bf16.mxu0 %v3571_v16  ;;  %v3627_v15 = vcombine.high %v441_v11, %v445_v12  ;;  %v3629_v16 = vcombine.high %v442_v13, %v446_v32 }
 0x16a   :  { %2060 = vmatprep.subr.bf16.mxu1 %v3573_v17  ;;  %v449_v17 = vld [vmem:[%s5245_s4 + $0x6d0] sm:$0xff] }
 0x16b   :  { %v3634_v30 = vcombine.low %v449_v17, %v453_v18 }
 0x16c   :  { %1979 = vmatpush1.bf16.msra.mxu0 %v3570_v23  ;;  %v3628_v23 = vcombine.low %v442_v13, %v446_v32 }
 0x16d   :  { %2061 = vmatpush1.bf16.msra.mxu1 %v3572_v24  ;;  %1980 = vmatprep.subr.bf16.mxu0 %v3579_v25  ;;  %v3635_v24 = vcombine.high %v449_v17, %v453_v18  ;;  %v3637_v25 = vcombine.high %v450_v20, %v454_v21 }
 0x16e   :  { %2062 = vmatprep.subr.bf16.mxu1 %v3581_v26  ;;  %v457_v26 = vld [vmem:[%s5245_s4 + $0x710] sm:$0xff] }
 0x16f   :  { %v3642_v40 = vcombine.low %v457_v26, %v461_v27 }
 0x170   :  { %1981 = vmatpush1.bf16.msra.mxu0 %v3578_v31  ;;  %v3636_v31 = vcombine.low %v450_v20, %v454_v21 }
 0x171   :  { %2063 = vmatpush1.bf16.msra.mxu1 %v3580_v34  ;;  %1982 = vmatprep.subr.bf16.mxu0 %v3587_v35  ;;  %v3643_v34 = vcombine.high %v457_v26, %v461_v27  ;;  %v3645_v35 = vcombine.high %v458_v28, %v462_v29 }
 0x172   :  { %2064 = vmatprep.subr.bf16.mxu1 %v3589_v36  ;;  %v465_v36 = vld [vmem:[%s5245_s4 + $0x750] sm:$0xff] }
 0x173   :  { %v3651_v42 = vcombine.high %v465_v36, %v469_v37  ;;  %v3650_v49 = vcombine.low %v465_v36, %v469_v37 }
 0x174   :  { %1983 = vmatpush1.bf16.msra.mxu0 %v3586_v41  ;;  %v3644_v41 = vcombine.low %v458_v28, %v462_v29 }
 0x175   :  { %2065 = vmatpush1.bf16.msra.mxu1 %v3588_v43  ;;  %1984 = vmatprep.subr.bf16.mxu0 %v3595_v45  ;;  %v3653_v43 = vcombine.high %v466_v38, %v470_v39  ;;  %v473_v45 = vld [vmem:[%s5245_s4 + $0x790] sm:$0xff] }
 0x176   :  { %2066 = vmatprep.subr.bf16.mxu1 %v3597_v48  ;;  %v478_v48 = vld [vmem:[%s5245_s4 + $0x7b8] sm:$0xff]  ;;  %v3659_v51 = vcombine.high %v473_v45, %v477_v46 }
 0x177   :  { %v3661_v52 = vcombine.high %v474_v47, %v478_v48 }
 0x178   :  { %1985 = vmatpush1.bf16.msra.mxu0 %v3594_v19  ;;  %v482_v19 = vld [vmem:[%s5245_s4 + $0x7d8] sm:$0xff] }
 0x179   :  { %2067 = vmatpush1.bf16.msra.mxu1 %v3596_v44  ;;  %1986 = vmatprep.subr.bf16.mxu0 %v3603_v56  ;;  %v486_v44 = vld [vmem:[%s5245_s4 + $0x7f8] sm:$0xff]  ;;  %v3658_v56 = vcombine.low %v473_v45, %v477_v46 }
 0x17a   :  { %2068 = vmatprep.subr.bf16.mxu1 %v3605_v58  ;;  %v3660_v58 = vcombine.low %v474_v47, %v478_v48  ;;  %v3669_v60 = vcombine.high %v482_v19, %v486_v44  ;;  %v3668_v62 = vcombine.low %v482_v19, %v486_v44 }
 0x17c   :  { %1987 = vmatpush1.bf16.msra.mxu0 %v3602_v63  ;;  %v2104_v63 = vld [vmem:[%s5247_s1 + $0x8] sm:$0xff]  ;;  %s3882_s1 = smov 18  }
 0x17d   :  { %2069 = vmatpush1.bf16.msra.mxu1 %v3604_v0  ;;  %1988 = vmatprep.subr.bf16.mxu0 %v3611_v1  ;;  %v2107_v0 = vunpack.c.l.bf16 %v2104_v63  ;;  %v2108_v1 = vunpack.c.h.bf16 %v2104_v63 }
 0x17e   :  { %2070 = vmatprep.subr.bf16.mxu1 %v3613_v2 }
 0x17f   :  { %v2115_v6 = vcombine.low %v2107_v0, %v2107_v0  ;;  %2126 = vst [vmem:[#allocation2 + $0x28] sm:$0xf0] %v2107_v0  ;;  %2128 = vst [vmem:[#allocation2 + $0x38] sm:$0xf0] %v2108_v1 }
 0x180   :  { %1989 = vmatpush1.bf16.msra.mxu0 %v3610_v33  ;;  %v2116_v33 = vcombine.low %v2108_v1, %v2108_v1 }
 0x181   :  { %2071 = vmatpush1.bf16.msra.mxu1 %v3612_v7  ;;  %1990 = vmatprep.subr.bf16.mxu0 %v3619_v8  ;;  %2125 = vst [vmem:[#allocation2 + $0x20] sm:$0xf0] %v2115_v6 }
 0x182   :  { %2072 = vmatprep.subr.bf16.mxu1 %v3621_v10  ;;  %2127 = vst [vmem:[#allocation2 + $0x30] sm:$0xf0] %v2116_v33 }
 0x184   :  { %1991 = vmatpush1.bf16.msra.mxu0 %v3618_v14 }
 0x185   :  { %2073 = vmatpush1.bf16.msra.mxu1 %v3620_v57  ;;  %1992 = vmatprep.subr.bf16.mxu0 %v3627_v15 }
 0x186   :  { %2074 = vmatprep.subr.bf16.mxu1 %v3629_v16 }
 0x188   :  { %1993 = vmatpush1.bf16.msra.mxu0 %v3626_v22 }
 0x189   :  { %2075 = vmatpush1.bf16.msra.mxu1 %v3628_v23  ;;  %1994 = vmatprep.subr.bf16.mxu0 %v3635_v24 }
 0x18a   :  { %2076 = vmatprep.subr.bf16.mxu1 %v3637_v25 }
 0x18c   :  { %1995 = vmatpush1.bf16.msra.mxu0 %v3634_v30 }
 0x18d   :  { %2077 = vmatpush1.bf16.msra.mxu1 %v3636_v31  ;;  %1996 = vmatprep.subr.bf16.mxu0 %v3643_v34 }
 0x18e   :  { %2078 = vmatprep.subr.bf16.mxu1 %v3645_v35 }
 0x190   :  { %1997 = vmatpush1.bf16.msra.mxu0 %v3642_v40 }
 0x191   :  { %2079 = vmatpush1.bf16.msra.mxu1 %v3644_v41  ;;  %1998 = vmatprep.subr.bf16.mxu0 %v3651_v42 }
 0x192   :  { %2080 = vmatprep.subr.bf16.mxu1 %v3653_v43 }
 0x194   :  { %1999 = vmatpush1.bf16.msra.mxu0 %v3650_v49 }
 0x195   :  { %2081 = vmatpush1.bf16.msra.mxu1 %v3652_v50  ;;  %2000 = vmatprep.subr.bf16.mxu0 %v3659_v51 }
 0x196   :  { %2082 = vmatprep.subr.bf16.mxu1 %v3661_v52 }
 0x198   :  { %2001 = vmatpush1.bf16.msra.mxu0 %v3658_v56 }
 0x199   :  { %2083 = vmatpush1.bf16.msra.mxu1 %v3660_v58  ;;  %2002 = vmatprep.subr.bf16.mxu0 %v3667_v59 }
 0x19a   :  { %2084 = vmatprep.subr.bf16.mxu1 %v3669_v60 }
 0x19c   :  { %2003 = vmatpush1.bf16.msra.mxu0 %v3666_v61 }
 0x19d   :  { %2085 = vmatpush1.bf16.msra.mxu1 %v3668_v62 }
 0x19f   :  { %2005 = vmatmul.mubr.bf16.vlgmr.msra.gmra.mrb[12].mxu0 %v4403_v55 }
 0x1a0   :  { %2087 = vmatmul.mubr.bf16.vlgmr.msra.gmra.mrb[12].mxu1 %v4403_v55  ;;  %2662 = vmatprep.mubr.bf16.mxu0 %v3881_v9 }
 0x1a1   :  { %2703 = vmatprep.mubr.bf16.mxu1 %v3881_v9 }
 0x1f2   :  { %v1842_v2 = vpop.f32.mrb[8].mxu0  ;;  %v1924_v3 = vpop.f32.mrb[8].mxu1 }
 0x1f3   :  { %2095 = vst [vmem:[#allocation2] sm:$0xf] %v1842_v2  ;;  %2097 = vst [vmem:[#allocation2 + $0x10] sm:$0xf] %v1924_v3  ;;  %v1844_v4 = vpop.f32.mrb[9].mxu0  ;;  %v1926_v5 = vpop.f32.mrb[9].mxu1 }
 0x1f4   :  { %2096 = vst [vmem:[#allocation2 + $0x8] sm:$0xf] %v1844_v4  ;;  %2098 = vst [vmem:[#allocation2 + $0x18] sm:$0xf] %v1926_v5  ;;  %v1846_v55 = vpop.f32.mrb[10].mxu0  ;;  %v1928_v7 = vpop.f32.mrb[10].mxu1 }
 0x1f5   :  { %v1847_v8 = vpop.f32.mrb[11].mxu0  ;;  %v1929_v10 = vpop.f32.mrb[11].mxu1 }
 0x1fa   :  { %v4783_v11 = vld [vmem:[#allocation2 + $0x10] sm:$0xff]  ;;  %v2129_v32 = vld [vmem:[#allocation2] sm:$0xff] }
 0x1fb   :  { %v4785_v12 = vld [vmem:[#allocation2 + $0x8] sm:$0xff]  ;;  %v4789_v14 = vld [vmem:[#allocation2 + $0x18] sm:$0xff] }
 0x1fc   :  { %v3747_v13 = vpack.i.bf16 %v4783_v11, %v4785_v12  ;;  %v3752_v57 = vpack.i.bf16 %v4789_v14, %v2129_v32  ;;  %v3782_v15 = vpack.i.bf16 %v4789_v14, %v4783_v11 }
 0x1fe   :  { %3748 = vrot.lane.b32.xlu1 %v3747_v13, %s3882_s1  ;;  %3743 = vrot.lane.b32.xlu0 %v3747_v13, %s3883_s13 }
 0x202   :  { %3753 = vrot.lane.b32.xlu1 %v3752_v57, %s3883_s13  ;;  %3758 = vrot.lane.b32.xlu0 %v3752_v57, %s3882_s1 }
 0x206   :  { %3763 = vrot.lane.b32.xlu1 %v3747_v13, %s3884_s3  ;;  %3768 = vrot.lane.b32.xlu0 %v3747_v13, %s3885_s14 }
 0x20a   :  { %3773 = vrot.lane.b32.xlu1 %v3752_v57, %s3884_s3  ;;  %3778 = vrot.lane.b32.xlu0 %v3752_v57, %s3885_s14 }
 0x20e   :  { %3783 = vrot.lane.b32.xlu1 %v3782_v15, %s3886_s15  ;;  %3793 = vrot.lane.b32.xlu0 %v3782_v15, %s3887_s16 }
 0x212   :  { %3788 = vrot.lane.b32.xlu1 %v3782_v15, %s3888_s17  ;;  %3798 = vrot.lane.b32.xlu0 %v3747_v13, %s3889_s18 }
 0x216   :  { %2488 = vrot.lane.b32.xlu1 %v4789_v14, %s3889_s18 }
 0x270   :  { %v3749_v16 = vpop.permute.xlu1 %3748  ;;  %v3744_v17 = vpop.permute.xlu0 %3743 }
 0x271   :  { %v3751_v18 = vunpack.i.h.bf16 %v3749_v16  ;;  %v3750_v20 = vunpack.i.l.bf16 %v3749_v16  ;;  %v3746_v21 = vunpack.i.h.bf16 %v3744_v17  ;;  %v3745_v22 = vunpack.i.l.bf16 %v3744_v17 }
 0x272   :  { %v2006_v23 = vpop.f32.mrb[12].mxu0 }
 0x273   :  { %2099 = vst [vmem:[#allocation2 + $0x20] sm:$0xf] %v2006_v23  ;;  %v2088_v24 = vpop.f32.mrb[12].mxu1  ;;  %v2008_v25 = vpop.f32.mrb[13].mxu0  ;;  %v2159_v26 = vsel %vm2157_vm3, %v3745_v22, %v3746_v21  ;;  %v2206_v27 = vsel %vm2204_vm4, %v3750_v20, %v3751_v18 }
 0x274   :  { %2101 = vst [vmem:[#allocation2 + $0x30] sm:$0xf] %v2088_v24  ;;  %2100 = vst [vmem:[#allocation2 + $0x28] sm:$0xf] %v2008_v25  ;;  %v2090_v28 = vpop.f32.mrb[13].mxu1  ;;  %v4810_v29 = vpop.permute.xlu1 %3753  ;;  %v2573_v30 = vpack.c.bf16 %v2206_v27, %v2159_v26 }
 0x275   :  { %2102 = vst [vmem:[#allocation2 + $0x38] sm:$0xf] %v2090_v28  ;;  %v2092_v31 = vpop.f32.mrb[14].mxu1  ;;  %v3756_v34 = vunpack.i.h.bf16 %v4810_v29  ;;  %v3755_v35 = vunpack.i.l.bf16 %v4810_v29  ;;  %v4814_v36 = vpop.permute.xlu0 %3758 }
 0x276   :  { %v3761_v37 = vunpack.i.h.bf16 %v4814_v36  ;;  %v3760_v38 = vunpack.i.l.bf16 %v4814_v36  ;;  %v2010_v39 = vpop.f32.mrb[14].mxu0  ;;  %v2093_v40 = vpop.f32.mrb[15].mxu1  ;;  %2630 = vmatprep.subr.bf16.mxu0 %v2573_v30 }
 0x277   :  { %v2158_v41 = vsel %vm2157_vm3, %v3755_v35, %v3745_v22  ;;  %v4822_v42 = vsel %vm2157_vm3, %v3746_v21, %v3756_v34  ;;  %v2011_v43 = vpop.f32.mrb[15].mxu0 }
 0x278   :  { %v4827_v45 = vsel %vm2204_vm4, %v3751_v18, %v3761_v37  ;;  %v2205_v46 = vsel %vm2204_vm4, %v3760_v38, %v3750_v20  ;;  %v3764_v47 = vpop.permute.xlu1 %3763  ;;  %v2602_v18 = vld [vmem:[%s5248_s6] sm:$0xf] }
 0x279   :  { %v2572_v48 = vpack.c.bf16 %v2205_v46, %v2158_v41  ;;  %v2574_v49 = vpack.c.bf16 %v4827_v45, %v4822_v42  ;;  %v3766_v50 = vunpack.i.h.bf16 %v3764_v47  ;;  %v3765_v51 = vunpack.i.l.bf16 %v3764_v47  ;;  %v3769_v52 = vpop.permute.xlu0 %3768 }
 0x27a   :  { %v3771_v53 = vunpack.i.h.bf16 %v3769_v52  ;;  %v3770_v54 = vunpack.i.l.bf16 %v3769_v52  ;;  %v4832_v19 = vld [vmem:[#allocation2 + $0x20] sm:$0xff] }
 0x27b   :  { %2631 = vmatpush1.bf16.msra.mxu0 %v2572_v48  ;;  %v3807_v44 = vpack.i.bf16 %v4832_v19, %v4785_v12  ;;  %v2253_v56 = vsel %vm2251_vm5, %v3765_v51, %v3766_v50  ;;  %v4840_v60 = vld [vmem:[#allocation2 + $0x28] sm:$0xff]  ;;  %v4876_v57 = vld [vmem:[#allocation2 + $0x30] sm:$0xff] }
 0x27c   :  { %v4837_v58 = vpop.permute.xlu1 %3773  ;;  %v2300_v59 = vsel %vm2298_vm6, %v3770_v54, %v3771_v53  ;;  %v3817_v5 = vpack.i.bf16 %v4840_v60, %v4832_v19  ;;  %v2335_v16 = vld [vmem:[#allocation2 + $0x38] sm:$0xff] }
 0x27d   :  { %v3776_v61 = vunpack.i.h.bf16 %v4837_v58  ;;  %v3775_v62 = vunpack.i.l.bf16 %v4837_v58  ;;  %v4844_v63 = vpop.permute.xlu0 %3778  ;;  %3808 = vrot.lane.b32.xlu1 %v3807_v44, %s3888_s17  ;;  %3803 = vrot.lane.b32.xlu0 %v3807_v44, %s3886_s15  ;;  %v2579_v0 = vpack.c.bf16 %v2300_v59, %v2253_v56  ;;  %v3842_v17 = vpack.i.bf16 %v2335_v16, %v4876_v57 }
 0x27e   :  { %v3781_v1 = vunpack.i.h.bf16 %v4844_v63  ;;  %v3780_v2 = vunpack.i.l.bf16 %v4844_v63  ;;  %v4959_v63 = vld [vmem:[%s5249_s5] sm:$0x3] }
 0x27f   :  { %v2252_v3 = vsel %vm2251_vm5, %v3775_v62, %v3765_v51  ;;  %v4854_v4 = vsel %vm2251_vm5, %v3766_v50, %v3776_v61  ;;  %2632 = vmatprep.subr.bf16.mxu0 %v2579_v0 }
 0x280   :  { %v2299_v6 = vsel %vm2298_vm6, %v3780_v2, %v3770_v54  ;;  %v4862_v33 = vsel %vm2298_vm6, %v3771_v53, %v3781_v1  ;;  %v4864_v55 = vpop.permute.xlu1 %3783 }
 0x281   :  { %v2578_v7 = vpack.c.bf16 %v2299_v6, %v2252_v3  ;;  %v2580_v8 = vpack.c.bf16 %v4862_v33, %v4854_v4  ;;  %v3786_v10 = vunpack.i.h.bf16 %v4864_v55  ;;  %v3785_v13 = vunpack.i.l.bf16 %v4864_v55  ;;  %2292 = vrot.lane.b32.xlu0 %v4832_v19, %s3885_s14  ;;  %3818 = vrot.lane.b32.xlu1 %v3817_v5, %s3883_s13  ;;  %v4906_v20 = vpop.permute.xlu0 %3793 }
 0x282   :  { %v3796_v26 = vunpack.i.h.bf16 %v4906_v20  ;;  %v3795_v27 = vunpack.i.l.bf16 %v4906_v20 }
 0x283   :  { %2633 = vmatpush1.bf16.msra.mxu0 %v2578_v7  ;;  %v2359_v32 = vsel %vm2357_vm7, %v3785_v13, %v3786_v10 }
 0x284   :  { %v2585_v15 = vpack.c.bf16 %v2359_v32, %v4783_v11  ;;  %v3832_v11 = vpack.i.bf16 %v4876_v57, %v4840_v60  ;;  %v4908_v21 = vpop.permute.xlu1 %3788  ;;  %v2453_v47 = vsel %vm2451_vm9, %v3795_v27, %v3796_v26 }
 0x285   :  { %3813 = vrot.lane.b32.xlu0 %v3807_v44, %s3887_s16  ;;  %2202 = vrot.lane.b32.xlu1 %v4876_v57, %s3882_s1  ;;  %v3799_v22 = vpop.permute.xlu0 %3798  ;;  %v3791_v24 = vunpack.i.h.bf16 %v4908_v21  ;;  %v3790_v25 = vunpack.i.l.bf16 %v4908_v21 }
 0x286   :  { %2634 = vmatprep.subr.bf16.mxu0 %v2585_v15  ;;  %v3801_v39 = vunpack.i.h.bf16 %v3799_v22  ;;  %v3800_v40 = vunpack.i.l.bf16 %v3799_v22 }
 0x287   :  { %v2406_v35 = vsel %vm2404_vm8, %v3790_v25, %v3791_v24 }
 0x288   :  { %v4910_v23 = vpop.permute.xlu1 %2488  ;;  %v2591_v48 = vpack.c.bf16 %v2453_v47, %v2406_v35  ;;  %v2499_v53 = vsel %vm2498_vm10, %v3800_v40, %v3801_v39 }
 0x289   :  { %3823 = vrot.lane.b32.xlu0 %v3817_v5, %s3882_s1  ;;  %3828 = vrot.lane.b32.xlu1 %v3817_v5, %s3884_s3  ;;  %v2596_v62 = vpack.c.bf16 %v2499_v53, %v2499_v53 }
 0x28b   :  { %v2613_v15 = vsel %vm48_vm0, %v2596_v62, 0 }
 0x28d   :  { %2155 = vrot.lane.b32.xlu0 %v4876_v57, %s3883_s13  ;;  %2351 = vrot.lane.b32.xlu1 %v4840_v60, %s3886_s15 }
 0x291   :  { %2249 = vrot.lane.b32.xlu0 %v4876_v57, %s3884_s3  ;;  %2445 = vrot.lane.b32.xlu1 %v4840_v60, %s3887_s16 }
 0x295   :  { %2398 = vrot.lane.b32.xlu0 %v4840_v60, %s3888_s17  ;;  %3833 = vrot.lane.b32.xlu1 %v3832_v11, %s3885_s14 }
 0x299   :  { %3838 = vrot.lane.b32.xlu0 %v3817_v5, %s3889_s18  ;;  %3843 = vrot.lane.b32.xlu1 %v3842_v17, %s3886_s15 }
 0x29d   :  { %3848 = vrot.lane.b32.xlu0 %v3842_v17, %s3888_s17  ;;  %3853 = vrot.lane.b32.xlu1 %v3842_v17, %s3887_s16 }
 0x2a1   :  { %3858 = vrot.lane.b32.xlu0 %v3842_v17, %s3889_s18  ;;  %2605 = vperm.xlu1 %3862, %v2602_v18  }
 0x2ef   :  { %v4916_v28 = vpop.permute.xlu1 %3808  ;;  %v4918_v30 = vpop.permute.xlu0 %3803 }
 0x2f0   :  { %v3805_v31 = vunpack.i.l.bf16 %v4918_v30  ;;  %v3810_v50 = vunpack.i.l.bf16 %v4916_v28  ;;  %v3806_v17 = vunpack.i.h.bf16 %v4918_v30 }
 0x2f2   :  { %v2358_v38 = vsel %vm2357_vm7, %v3805_v31, %v3785_v13  ;;  %v2405_v44 = vsel %vm2404_vm8, %v3810_v50, %v3790_v25  ;;  %v2360_v40 = vsel %vm2357_vm7, %v3786_v10, %v3806_v17 }
 0x2f3   :  { %v2584_v41 = vpack.c.bf16 %v2358_v38, %v4785_v12  ;;  %v4926_v43 = vpop.permute.xlu0 %2292  ;;  %v3819_v46 = vpop.permute.xlu1 %3818  ;;  %v2500_v12 = vsel %vm2498_vm10, %v3801_v39, %v4910_v23  ;;  %v2586_v45 = vpack.c.bf16 %v2360_v40, %v4789_v14 }
 0x2f4   :  { %v3820_v56 = vunpack.i.l.bf16 %v3819_v46  ;;  %v2597_v5 = vpack.c.bf16 %v2500_v12, %v2500_v12  ;;  %v3821_v32 = vunpack.i.h.bf16 %v3819_v46  ;;  %v2302_v18 = vsel %vm2298_vm6, %v3781_v1, %v4926_v43 }
 0x2f5   :  { %2635 = vmatpush1.bf16.msra.mxu0 %v2584_v41  ;;  %v3811_v41 = vunpack.i.h.bf16 %v4916_v28 }
 0x2f6   :  { %2636 = vmatprep.subr.bf16.mxu0 %v2591_v48  ;;  %v2161_v11 = vsel %vm2157_vm3, %v3756_v34, %v3820_v56  ;;  %v2162_v58 = vsel %vm2157_vm3, %v3820_v56, %v3821_v32 }
 0x2f7   :  { %v3814_v51 = vpop.permute.xlu0 %3813  ;;  %v2203_v52 = vpop.permute.xlu1 %2202  ;;  %v2407_v4 = vsel %vm2404_vm8, %v3791_v24, %v3811_v41 }
 0x2f8   :  { %v3815_v54 = vunpack.i.l.bf16 %v3814_v51  ;;  %v3816_v1 = vunpack.i.h.bf16 %v3814_v51 }
 0x2fa   :  { %v2452_v59 = vsel %vm2451_vm9, %v3815_v54, %v3795_v27 }
 0x2fb   :  { %v2590_v0 = vpack.c.bf16 %v2452_v59, %v2405_v44  ;;  %v3824_v2 = vpop.permute.xlu0 %3823  ;;  %v3829_v3 = vpop.permute.xlu1 %3828 }
 0x2fc   :  { %v3826_v6 = vunpack.i.h.bf16 %v3824_v2  ;;  %v3825_v7 = vunpack.i.l.bf16 %v3824_v2  ;;  %v3830_v13 = vunpack.i.l.bf16 %v3829_v3  ;;  %v3831_v42 = vunpack.i.h.bf16 %v3829_v3 }
 0x2fd   :  { %2637 = vmatpush1.bf16.msra.mxu0 %v2590_v0 }
 0x2fe   :  { %3670 = vmatprep.subr.msk.bf16.mxu0 %vm48_vm0, %v2597_v5  ;;  %v2208_v16 = vsel %vm2204_vm4, %v3761_v37, %v3825_v7  ;;  %v2255_v29 = vsel %vm2251_vm5, %v3776_v61, %v3830_v13  ;;  %v2209_v34 = vsel %vm2204_vm4, %v3825_v7, %v3826_v6  ;;  %v2210_v37 = vsel %vm2204_vm4, %v3826_v6, %v2203_v52 }
 0x2ff   :  { %v2156_v22 = vpop.permute.xlu0 %2155  ;;  %v2352_v25 = vpop.permute.xlu1 %2351  ;;  %v2575_v27 = vpack.c.bf16 %v2208_v16, %v2161_v11  ;;  %v2581_v31 = vpack.c.bf16 %v2302_v18, %v2255_v29  ;;  %v2576_v35 = vpack.c.bf16 %v2209_v34, %v2162_v58  ;;  %v2256_v14 = vsel %vm2251_vm5, %v3830_v13, %v3831_v42  ;;  %v3863_v58 = vld [vmem:[#allocation3 + $0x1c] ss:$0 sps:$4 sm:$0xff]  }
 0x300   :  { %v2163_v36 = vsel %vm2157_vm3, %v3821_v32, %v2156_v22  ;;  %v2361_v61 = vsel %vm2357_vm7, %v3806_v17, %v2352_v25  ;;  %3031 = vrot.lane.b32.xlu1 %v3863_v58, %s3886_s15 }
 0x301   :  { %v2577_v30 = vpack.c.bf16 %v2210_v37, %v2163_v36  ;;  %2639 = vmatpush1.bf16.msra.mxu0 %v2613_v15  ;;  %2671 = vmatprep.subr.bf16.mxu1 %v2575_v27  ;;  %v2587_v46 = vpack.c.bf16 %v2361_v61, %v4832_v19  ;;  %v3054_v61 = vld [vmem:[#allocation3 + $0x1c] sm:$0xf] }
 0x302   :  { %2672 = vmatpush1.bf16.msra.mxu1 %v2574_v49  ;;  %v2454_v49 = vsel %vm2451_vm9, %v3796_v26, %v3816_v1 }
 0x303   :  { %v2250_v38 = vpop.permute.xlu0 %2249  ;;  %v2446_v39 = vpop.permute.xlu1 %2445  ;;  %2673 = vmatprep.subr.bf16.mxu1 %v2581_v31  ;;  %2712 = vmatprep.subr.bf16.mxu0 %v2577_v30  ;;  %v2592_v50 = vpack.c.bf16 %v2454_v49, %v2407_v4 }
 0x304   :  { %3671 = vmatmul.mubr.msk.bf16.vlgmr.msra.gmra.mrb[16].mxu0 %vm2608_vm11, %v4959_v63  ;;  %v2455_v28 = vsel %vm2451_vm9, %v3816_v1, %v2446_v39  ;;  %3074 = vrot.lane.b32.xlu1 %v3054_v61, %s3888_s17  ;;  %v3864_v1 = vld [vmem:[#allocation3 + $0x1c] ss:$0 sps:$4 sm:$0xff]  }
 0x305   :  { %2713 = vmatpush1.bf16.msra.mxu0 %v2576_v35  ;;  %2744 = vmatprep.mubr.bf16.mxu0 %v3881_v9  ;;  %v2762_v35 = vlaneseq }
 0x306   :  { %2674 = vmatpush1.bf16.msra.mxu1 %v2580_v8  ;;  %v2257_v8 = vsel %vm2251_vm5, %v3831_v42, %v2250_v38  ;;  %v2759_v38 = vld [vmem:[%s5250_s9] sm:$0x3f] }
 0x307   :  { %v2399_v55 = vpop.permute.xlu0 %2398  ;;  %v3834_v10 = vpop.permute.xlu1 %3833  ;;  %2675 = vmatprep.subr.bf16.mxu1 %v2587_v46  ;;  %vm2760_vm12 = vcmp.gt.f32.partialorder %v2759_v38, 0.5 }
 0x308   :  { %v2408_v19 = vsel %vm2404_vm8, %v3811_v41, %v2399_v55  ;;  %v3836_v47 = vunpack.i.h.bf16 %v3834_v10  ;;  %v3835_v48 = vunpack.i.l.bf16 %v3834_v10  ;;  %3118 = vrot.lane.b32.xlu1 %v3864_v1, %s3887_s16 }
 0x309   :  { %v2593_v33 = vpack.c.bf16 %v2455_v28, %v2408_v19 }
 0x30a   :  { %v2303_v20 = vsel %vm2298_vm6, %v4926_v43, %v3835_v48  ;;  %2676 = vmatpush1.bf16.msra.mxu1 %v2586_v45  ;;  %v2304_v26 = vsel %vm2298_vm6, %v3835_v48, %v3836_v47 }
 0x30b   :  { %v2582_v51 = vpack.c.bf16 %v2303_v20, %v2256_v14  ;;  %v3839_v52 = vpop.permute.xlu0 %3838  ;;  %v3844_v53 = vpop.permute.xlu1 %3843  ;;  %2677 = vmatprep.subr.bf16.mxu1 %v2593_v33  ;;  %v2583_v54 = vpack.c.bf16 %v2304_v26, %v2257_v8 }
 0x30c   :  { %v3841_v21 = vunpack.i.h.bf16 %v3839_v52  ;;  %v3840_v12 = vunpack.i.l.bf16 %v3839_v52  ;;  %v3846_v24 = vunpack.i.h.bf16 %v3844_v53  ;;  %v3845_v44 = vunpack.i.l.bf16 %v3844_v53 }
 0x30d   :  { %2714 = vmatprep.subr.bf16.mxu0 %v2583_v54 }
 0x30e   :  { %v2502_v56 = vsel %vm2498_vm10, %v3840_v12, %v3841_v21  ;;  %v2362_v59 = vsel %vm2357_vm7, %v2352_v25, %v3845_v44  ;;  %2678 = vmatpush1.bf16.msra.mxu1 %v2592_v50  ;;  %2715 = vmatpush1.bf16.msra.mxu0 %v2582_v51  ;;  %v2363_v43 = vsel %vm2357_vm7, %v3845_v44, %v3846_v24 }
 0x30f   :  { %v2599_v62 = vpack.c.bf16 %v2502_v56, %v2502_v56  ;;  %v2588_v0 = vpack.c.bf16 %v2362_v59, %v4840_v60  ;;  %v3849_v2 = vpop.permute.xlu0 %3848  ;;  %v3854_v3 = vpop.permute.xlu1 %3853  ;;  %v2589_v5 = vpack.c.bf16 %v2363_v43, %v4876_v57  ;;  %v2501_v6 = vsel %vm2498_vm10, %v4910_v23, %v3840_v12 }
 0x310   :  { %v3851_v7 = vunpack.i.h.bf16 %v3849_v2  ;;  %v3850_v13 = vunpack.i.l.bf16 %v3849_v2  ;;  %v3856_v32 = vunpack.i.h.bf16 %v3854_v3  ;;  %v3855_v15 = vunpack.i.l.bf16 %v3854_v3 }
 0x311   :  { %3672 = vmatprep.subr.msk.bf16.mxu1 %vm48_vm0, %v2599_v62  ;;  %2716 = vmatprep.subr.bf16.mxu0 %v2589_v5  ;;  %v2598_v11 = vpack.c.bf16 %v2501_v6, %v2501_v6 }
 0x312   :  { %v2409_v16 = vsel %vm2404_vm8, %v2399_v55, %v3850_v13  ;;  %v2456_v17 = vsel %vm2451_vm9, %v2446_v39, %v3855_v15  ;;  %2717 = vmatpush1.bf16.msra.mxu0 %v2588_v0  ;;  %v2410_v60 = vsel %vm2404_vm8, %v3850_v13, %v3851_v7  ;;  %v2457_v57 = vsel %vm2451_vm9, %v3855_v15, %v3856_v32 }
 0x313   :  { %v2594_v18 = vpack.c.bf16 %v2456_v17, %v2409_v16  ;;  %v2619_v23 = vsel %vm48_vm0, %v2598_v11, 0  ;;  %v3859_v22 = vpop.permute.xlu0 %3858  ;;  %v2595_v25 = vpack.c.bf16 %v2457_v57, %v2410_v60  ;;  %v2763_v39 = vshrl.u32 %v2762_v35, 7 }
 0x314   :  { %2680 = vmatpush1.bf16.msra.mxu1 %v2619_v23  ;;  %v3861_v27 = vunpack.i.h.bf16 %v3859_v22  ;;  %v3860_v29 = vunpack.i.l.bf16 %v3859_v22 }
 0x315   :  { %2718 = vmatprep.subr.bf16.mxu0 %v2595_v25  ;;  %v2764_v40 = vsub.s32 0, %v2763_v39  ;;  %v2768_v41 = vsub.s32 1, %v2763_v39  ;;  %v2772_v26 = vsub.s32 2, %v2763_v39  ;;  %v2776_v50 = vsub.s32 3, %v2763_v39 }
 0x316   :  { %v2504_v34 = vsel %vm2498_vm10, %v3860_v29, %v3861_v27  ;;  %2719 = vmatpush1.bf16.msra.mxu0 %v2594_v18  ;;  %v2503_v36 = vsel %vm2498_vm10, %v3841_v21, %v3860_v29  ;;  %v2780_v12 = vsub.s32 4, %v2763_v39  ;;  %v2784_v56 = vsub.s32 5, %v2763_v39 }
 0x317   :  { %v2601_v37 = vpack.c.bf16 %v2504_v34, %v2504_v34  ;;  %3673 = vmatmul.mubr.msk.bf16.vlgmr.msra.gmra.mrb[16].mxu1 %vm2608_vm11, %v4959_v63  ;;  %v2600_v31 = vpack.c.bf16 %v2503_v36, %v2503_v36 }
 0x318   :  { %3291 = vmatprep.mubr.bf16.mxu1 %v3881_v9 }
 0x319   :  { %3674 = vmatprep.subr.msk.bf16.mxu0 %vm48_vm0, %v2601_v37  ;;  %v2625_v30 = vsel %vm48_vm0, %v2600_v31, 0 }
 0x31a   :  { %2721 = vmatpush1.bf16.msra.mxu0 %v2625_v30 }
 0x31d   :  { %3675 = vmatmul.mubr.msk.bf16.vlgmr.msra.gmra.mrb[20].mxu0 %vm2608_vm11, %v4959_v63  ;;  %v2761_v63 = vsel %vm2760_vm12, 1, %v3881_v9  ;;  %vm3236_vm11 = vcmask 293888  }
 0x31e   :  { %3373 = vmatprep.mubr.bf16.mxu0 %v3881_v9  ;;  %v2765_v42 = vrot.slane %v2761_v63, %v2764_v40  ;;  %v2769_v45 = vrot.slane %v2761_v63, %v2768_v41  ;;  %v2773_v52 = vrot.slane %v2761_v63, %v2772_v26  ;;  %v2777_v54 = vrot.slane %v2761_v63, %v2776_v50 }
 0x31f   :  { %v2781_v3 = vrot.slane %v2761_v63, %v2780_v12  ;;  %v2785_v6 = vrot.slane %v2761_v63, %v2784_v56 }
 0x320   :  { %v2606_v46 = vpop.permute.xlu1 %2605  ;;  %vm2786_vm13 = vcmp.eq.s32.totalorder %v2765_v42, 1  ;;  %vm2787_vm14 = vcmp.eq.s32.totalorder %v2769_v45, 1  ;;  %vm2788_vm15 = vcmp.eq.s32.totalorder %v2773_v52, 1  ;;  %vm2789_vm0 = vcmp.eq.s32.totalorder %v2777_v54, 1  ;;  %v3141_v45 = vld [vmem:[#allocation3 + $0x1c] sm:$0xf] }
 0x321   :  { %vm2790_vm1 = vcmp.eq.s32.totalorder %v2781_v3, 1  ;;  %vm2791_vm2 = vcmp.eq.s32.totalorder %v2785_v6, 1 }
 0x372   :  { %v5083_v63 = vpop.permute.xlu1 %3031 }
 0x376   :  { %v5088_v42 = vpop.permute.xlu1 %3074 }
 0x3d7   :  { %v2664_v49 = vpop.f32.mrb[16].mxu0 }
 0x3d8   :  { %v2665_v55 = vadd.f32 %v2664_v49, %v2606_v46  ;;  %v2666_v10 = vpop.f32.mrb[17].mxu0  ;;  %v5094_v49 = vpop.permute.xlu1 %3118 }
 0x3d9   :  { %v2667_v28 = vadd.f32 %v2666_v10, %v2606_v46  ;;  %v2668_v19 = vpop.f32.mrb[18].mxu0  ;;  %v3230_v10 = vld [vmem:[%s5251_s8] sm:$0xf] }
 0x3da   :  { %v2753_v47 = vmax.f32 %v2665_v55, 0.0  ;;  %v2669_v48 = vpop.f32.mrb[19].mxu0 }
 0x3db   :  { %v2754_v4 = vmax.f32 %v2667_v28, 0.0 }
 0x3dc   :  { %v5021_v33 = vsel %vm2786_vm13, %v2753_v47, 0.0 }
 0x3dd   :  { %v2793_v14 = vsel %vm2787_vm14, %v2754_v4, 0.0  ;;  %v3876_v37 = vcombine.low %v5021_v33, %v5021_v33 }
 0x3de   :  { %v2806_v8 = vcombine.low %v5021_v33, %v2793_v14  ;;  %v5025_v20 = vcombine.low %v2793_v14, %v2793_v14 }
 0x3e0   :  { %2812 = vst [vmem:[#allocation3 + $0x4] sm:$0xff] %v2806_v8  ;;  %3001 = vst [vmem:[#allocation5 + $0x60] sm:$0xf] %v2806_v8  ;;  %3062 = vrot.lane.b32.xlu1 %v2806_v8, %s3888_s17 }
 0x3e1   :  { %3002 = vst [vmem:[#allocation5 + $0x68] sm:$0xf] %v5025_v20 }
 0x3e4   :  { %3149 = vrot.lane.b32.xlu1 %v2806_v8, %s3889_s18 }
 0x3e7   :  { %v2858_v51 = vld [vmem:[#allocation3] sm:$0xff] }
 0x3e8   :  { %2872 = vrot.lane.b32.xlu0 %v2858_v51, %s3882_s1  ;;  %v2866_v53 = vcombine.low %v2858_v51, %v2858_v51  ;;  %v2823_v36 = vcombine.high %v2858_v51, %v2858_v51 }
 0x3ea   :  { %v2705_v21 = vpop.f32.mrb[16].mxu1  ;;  %2870 = vrot.lane.b32.xlu1 %v2866_v53, %s3882_s1 }
 0x3eb   :  { %v2706_v24 = vadd.f32 %v2705_v21, %v2606_v46  ;;  %v2707_v44 = vpop.f32.mrb[17].mxu1 }
 0x3ec   :  { %v2708_v59 = vadd.f32 %v2707_v44, %v2606_v46  ;;  %2959 = vrot.lane.b32.xlu0 %v2858_v51, %s3885_s14  ;;  %v2709_v43 = vpop.f32.mrb[18].mxu1 }
 0x3ed   :  { %v2755_v62 = vmax.f32 %v2706_v24, 0.0  ;;  %v2710_v0 = vpop.f32.mrb[19].mxu1 }
 0x3ee   :  { %v2756_v2 = vmax.f32 %v2708_v59, 0.0  ;;  %2957 = vrot.lane.b32.xlu1 %v2866_v53, %s3885_s14 }
 0x3ef   :  { %v2794_v5 = vsel %vm2788_vm15, %v2755_v62, 0.0 }
 0x3f0   :  { %v2795_v7 = vsel %vm2789_vm0, %v2756_v2, 0.0  ;;  %v2746_v13 = vpop.f32.mrb[20].mxu0  ;;  %2826 = vrot.lane.b32.xlu0 %v2858_v51, %s3883_s13  ;;  %v3877_v1 = vcombine.low %v2794_v5, %v2794_v5 }
 0x3f1   :  { %v2807_v32 = vcombine.low %v2794_v5, %v2795_v7  ;;  %v2747_v15 = vadd.f32 %v2746_v13, %v2606_v46  ;;  %v2748_v11 = vpop.f32.mrb[21].mxu0  ;;  %v5034_v57 = vcombine.low %v2795_v7, %v2795_v7 }
 0x3f2   :  { %v2749_v16 = vadd.f32 %v2748_v11, %v2606_v46  ;;  %v2750_v17 = vpop.f32.mrb[22].mxu0 }
 0x3f3   :  { %2813 = vst [vmem:[#allocation3 + $0xc] sm:$0xff] %v2807_v32  ;;  %3003 = vst [vmem:[#allocation5 + $0x70] sm:$0xf] %v2807_v32  ;;  %v2757_v60 = vmax.f32 %v2747_v15, 0.0  ;;  %v2751_v18 = vpop.f32.mrb[23].mxu0 }
 0x3f4   :  { %v2758_v23 = vmax.f32 %v2749_v16, 0.0  ;;  %2913 = vrot.lane.b32.xlu0 %v2858_v51, %s3884_s3  ;;  %3004 = vst [vmem:[#allocation5 + $0x78] sm:$0xf] %v5034_v57 }
 0x3f5   :  { %v2796_v22 = vsel %vm2790_vm1, %v2757_v60, 0.0 }
 0x3f6   :  { %v2797_v25 = vsel %vm2791_vm2, %v2758_v23, 0.0  ;;  %v3878_v41 = vcombine.low %v2796_v22, %v2796_v22 }
 0x3f7   :  { %v2808_v27 = vcombine.low %v2796_v22, %v2797_v25  ;;  %v5039_v29 = vcombine.low %v2797_v25, %v2797_v25 }
 0x3f8   :  { %3021 = vrot.lane.b32.xlu0 %v2806_v8, %s3886_s15 }
 0x3f9   :  { %2814 = vst [vmem:[#allocation3 + $0x14] sm:$0xff] %v2808_v27  ;;  %3005 = vst [vmem:[#allocation5 + $0x80] sm:$0xf] %v2808_v27 }
 0x3fa   :  { %v2816_v34 = vld [vmem:[#allocation3 + $0x8] sm:$0xff]  ;;  %3006 = vst [vmem:[#allocation5 + $0x88] sm:$0xf] %v5039_v29 }
 0x3fb   :  { %2830 = vrot.lane.b32.xlu1 %v2816_v34, %s3883_s13  ;;  %v2867_v61 = vcombine.low %v2816_v34, %v2816_v34  ;;  %v2824_v39 = vcombine.high %v2816_v34, %v2816_v34 }
 0x3fc   :  { %3108 = vrot.lane.b32.xlu0 %v2806_v8, %s3887_s16 }
 0x3ff   :  { %2917 = vrot.lane.b32.xlu1 %v2816_v34, %s3884_s3 }
 0x400   :  { %2828 = vrot.lane.b32.xlu0 %v2823_v36, %s3883_s13  ;;  %v2817_v31 = vld [vmem:[#allocation3 + $0x10] sm:$0xff]  ;;  %v2818_v30 = vld [vmem:[#allocation3 + $0x18] sm:$0xf] }
 0x401   :  { %v2905_v58 = vld [vmem:[#allocation3 + $0x18] sm:$0xf]  ;;  %v2868_v35 = vcombine.low %v2817_v31, %v2817_v31  ;;  %v2825_v46 = vcombine.high %v2817_v31, %v2817_v31 }
 0x402   :  { %v3871_v38 = vld [vmem:[#allocation3 + $0x18] ss:$0 sps:$4 sm:$0xff]  }
 0x403   :  { %3066 = vrot.lane.b32.xlu1 %v2807_v32, %s3888_s17  ;;  %v3872_v40 = vld [vmem:[#allocation3 + $0x18] ss:$0 sps:$4 sm:$0xff]  }
 0x404   :  { %2915 = vrot.lane.b32.xlu0 %v2823_v36, %s3884_s3 }
 0x407   :  { %3153 = vrot.lane.b32.xlu1 %v2807_v32, %s3889_s18 }
 0x408   :  { %3064 = vrot.lane.b32.xlu0 %v5025_v20, %s3888_s17 }
 0x40b   :  { %2834 = vrot.lane.b32.xlu1 %v2817_v31, %s3883_s13 }
 0x40c   :  { %3019 = vrot.lane.b32.xlu0 %v3876_v37, %s3886_s15 }
 0x40f   :  { %2838 = vrot.lane.b32.xlu1 %v2818_v30, %s3883_s13 }
 0x410   :  { %3106 = vrot.lane.b32.xlu0 %v3876_v37, %s3887_s16 }
 0x413   :  { %2921 = vrot.lane.b32.xlu1 %v2817_v31, %s3884_s3 }
 0x414   :  { %3151 = vrot.lane.b32.xlu0 %v5025_v20, %s3889_s18 }
 0x417   :  { %2925 = vrot.lane.b32.xlu1 %v2905_v58, %s3884_s3 }
 0x418   :  { %2876 = vrot.lane.b32.xlu0 %v2816_v34, %s3882_s1 }
 0x41b   :  { %3070 = vrot.lane.b32.xlu1 %v2808_v27, %s3888_s17 }
 0x41c   :  { %2963 = vrot.lane.b32.xlu0 %v2816_v34, %s3885_s14 }
 0x41f   :  { %3157 = vrot.lane.b32.xlu1 %v2808_v27, %s3889_s18 }
 0x420   :  { %3025 = vrot.lane.b32.xlu0 %v2807_v32, %s3886_s15 }
 0x423   :  { %2874 = vrot.lane.b32.xlu1 %v2867_v61, %s3882_s1 }
 0x424   :  { %3112 = vrot.lane.b32.xlu0 %v2807_v32, %s3887_s16 }
 0x427   :  { %2961 = vrot.lane.b32.xlu1 %v2867_v61, %s3885_s14 }
 0x428   :  { %2880 = vrot.lane.b32.xlu0 %v2817_v31, %s3882_s1 }
 0x42b   :  { %3023 = vrot.lane.b32.xlu1 %v3877_v1, %s3886_s15 }
 0x42c   :  { %2967 = vrot.lane.b32.xlu0 %v2817_v31, %s3885_s14 }
 0x42f   :  { %3110 = vrot.lane.b32.xlu1 %v3877_v1, %s3887_s16 }
 0x430   :  { %3029 = vrot.lane.b32.xlu0 %v2808_v27, %s3886_s15 }
 0x433   :  { %2878 = vrot.lane.b32.xlu1 %v2868_v35, %s3882_s1 }
 0x434   :  { %3116 = vrot.lane.b32.xlu0 %v2808_v27, %s3887_s16 }
 0x437   :  { %2882 = vrot.lane.b32.xlu1 %v3871_v38, %s3882_s1 }
 0x438   :  { %2832 = vrot.lane.b32.xlu0 %v2824_v39, %s3883_s13 }
 0x43b   :  { %2965 = vrot.lane.b32.xlu1 %v2868_v35, %s3885_s14 }
 0x43c   :  { %2919 = vrot.lane.b32.xlu0 %v2824_v39, %s3884_s3 }
 0x43f   :  { %2969 = vrot.lane.b32.xlu1 %v3872_v40, %s3885_s14 }
 0x440   :  { %3068 = vrot.lane.b32.xlu0 %v5034_v57, %s3888_s17 }
 0x443   :  { %3027 = vrot.lane.b32.xlu1 %v3878_v41, %s3886_s15 }
 0x444   :  { %3155 = vrot.lane.b32.xlu0 %v5034_v57, %s3889_s18 }
 0x447   :  { %3114 = vrot.lane.b32.xlu1 %v3878_v41, %s3887_s16 }
 0x448   :  { %2836 = vrot.lane.b32.xlu0 %v2825_v46, %s3883_s13 }
 0x44b   :  { %3161 = vrot.lane.b32.xlu1 %v3141_v45, %s3889_s18 }
 0x44c   :  { %2923 = vrot.lane.b32.xlu0 %v2825_v46, %s3884_s3 }
 0x450   :  { %3072 = vrot.lane.b32.xlu0 %v5039_v29, %s3888_s17 }
 0x452   :  { %v3063_v55 = vpop.permute.xlu1 %3062 }
 0x454   :  { %3159 = vrot.lane.b32.xlu0 %v5039_v29, %s3889_s18 }
 0x456   :  { %v3150_v28 = vpop.permute.xlu1 %3149 }
 0x458   :  { %3233 = vperm.xlu0 %3741, %v3230_v10  }
 0x45a   :  { %v2873_v19 = vpop.permute.xlu0 %2872 }
 0x45c   :  { %v2871_v47 = vpop.permute.xlu1 %2870 }
 0x45d   :  { %v2884_v48 = vsel %vm2204_vm4, %v2871_v47, %v2873_v19 }
 0x45e   :  { %v2960_v4 = vpop.permute.xlu0 %2959  ;;  %2896 = vst [vmem:[#allocation5] sm:$0xf0] %v2884_v48 }
 0x460   :  { %v2958_v33 = vpop.permute.xlu1 %2957 }
 0x461   :  { %v2971_v14 = vsel %vm2298_vm6, %v2958_v33, %v2960_v4 }
 0x462   :  { %v2827_v8 = vpop.permute.xlu0 %2826  ;;  %2983 = vst [vmem:[#allocation5 + $0x30] sm:$0xf0] %v2971_v14 }
 0x466   :  { %v2914_v20 = vpop.permute.xlu0 %2913 }
 0x46a   :  { %v3022_v26 = vpop.permute.xlu0 %3021 }
 0x46d   :  { %v5105_v50 = vpop.permute.xlu1 %2830 }
 0x46e   :  { %v3109_v51 = vpop.permute.xlu0 %3108 }
 0x471   :  { %v5107_v52 = vpop.permute.xlu1 %2917 }
 0x472   :  { %v2829_v53 = vpop.permute.xlu0 %2828 }
 0x473   :  { %v2840_v54 = vsel %vm2157_vm3, %v2827_v8, %v2829_v53  ;;  %v2841_v21 = vsel %vm2157_vm3, %v2829_v53, %v5105_v50 }
 0x474   :  { %2852 = vst [vmem:[#allocation5] sm:$0xf] %v2840_v54  ;;  %2853 = vst [vmem:[#allocation5 + $0x8] sm:$0xf] %v2841_v21 }
 0x475   :  { %v5112_v12 = vpop.permute.xlu1 %3066 }
 0x476   :  { %v2916_v24 = vpop.permute.xlu0 %2915 }
 0x477   :  { %v2927_v44 = vsel %vm2251_vm5, %v2914_v20, %v2916_v24  ;;  %v2928_v56 = vsel %vm2251_vm5, %v2916_v24, %v5107_v52 }
 0x478   :  { %2939 = vst [vmem:[#allocation5 + $0x30] sm:$0xf] %v2927_v44  ;;  %2940 = vst [vmem:[#allocation5 + $0x38] sm:$0xf] %v2928_v56 }
 0x479   :  { %v5117_v59 = vpop.permute.xlu1 %3153 }
 0x47a   :  { %v3065_v43 = vpop.permute.xlu0 %3064 }
 0x47b   :  { %v3076_v62 = vsel %vm2404_vm8, %v3063_v55, %v3065_v43  ;;  %v3077_v0 = vsel %vm2404_vm8, %v3065_v43, %v5112_v12 }
 0x47c   :  { %3088 = vst [vmem:[#allocation5 + $0x90] sm:$0xf] %v3076_v62  ;;  %3089 = vst [vmem:[#allocation5 + $0x98] sm:$0xf] %v3077_v0 }
 0x47d   :  { %v5122_v2 = vpop.permute.xlu1 %2834 }
 0x47e   :  { %v3020_v3 = vpop.permute.xlu0 %3019 }
 0x47f   :  { %v3033_v5 = vsel %vm2357_vm7, %v3020_v3, %v3022_v26  ;;  %v3188_v39 = vld [vmem:[#allocation5 + $0x30] sm:$0xff] }
 0x480   :  { %3045 = vst [vmem:[#allocation5 + $0x60] sm:$0xf0] %v3033_v5 }
 0x481   :  { %v5125_v6 = vpop.permute.xlu1 %2838 }
 0x482   :  { %v3107_v7 = vpop.permute.xlu0 %3106 }
 0x483   :  { %v3120_v13 = vsel %vm2451_vm9, %v3107_v7, %v3109_v51 }
 0x484   :  { %3132 = vst [vmem:[#allocation5 + $0x90] sm:$0xf0] %v3120_v13 }
 0x485   :  { %v5128_v32 = vpop.permute.xlu1 %2921 }
 0x486   :  { %v3152_v15 = vpop.permute.xlu0 %3151 }
 0x487   :  { %v3163_v11 = vsel %vm2498_vm10, %v3150_v28, %v3152_v15  ;;  %v3164_v16 = vsel %vm2498_vm10, %v3152_v15, %v5117_v59  ;;  %v3194_v62 = vld [vmem:[#allocation5 + $0x60] sm:$0xff] }
 0x488   :  { %3175 = vst [vmem:[#allocation5 + $0xc0] sm:$0xf] %v3163_v11  ;;  %3176 = vst [vmem:[#allocation5 + $0xc8] sm:$0xf] %v3164_v16 }
 0x489   :  { %v5133_v17 = vpop.permute.xlu1 %2925 }
 0x48a   :  { %v2877_v60 = vpop.permute.xlu0 %2876 }
 0x48b   :  { %v3200_v20 = vld [vmem:[#allocation5 + $0x90] sm:$0xff] }
 0x48d   :  { %v5135_v57 = vpop.permute.xlu1 %3070 }
 0x48e   :  { %v5137_v18 = vpop.permute.xlu0 %2963 }
 0x48f   :  { %v3206_v24 = vld [vmem:[#allocation5 + $0xc0] sm:$0xf] }
 0x490   :  { %v3224_v5 = vpack.c.bf16 %v3206_v24, %v3206_v24 }
 0x491   :  { %v5139_v23 = vpop.permute.xlu1 %3157 }
 0x492   :  { %v5141_v22 = vpop.permute.xlu0 %3025 }
 0x495   :  { %v2875_v25 = vpop.permute.xlu1 %2874 }
 0x496   :  { %v2885_v27 = vsel %vm2204_vm4, %v2873_v19, %v2875_v25  ;;  %v2886_v29 = vsel %vm2204_vm4, %v2875_v25, %v2877_v60  ;;  %v5145_v34 = vpop.permute.xlu0 %3112  ;;  %v3182_v19 = vld [vmem:[#allocation5] sm:$0xff] }
 0x497   :  { %2897 = vst [vmem:[#allocation5 + $0x8] sm:$0xf0] %v2885_v27  ;;  %2898 = vst [vmem:[#allocation5 + $0x10] sm:$0xf0] %v2886_v29  ;;  %v3212_v47 = vpack.c.bf16 %v3188_v39, %v3182_v19  ;;  %v5190_v27 = vld [vmem:[%s5252_s7] sm:$0x3] }
 0x499   :  { %v2962_v36 = vpop.permute.xlu1 %2961 }
 0x49a   :  { %v2972_v37 = vsel %vm2298_vm6, %v2960_v4, %v2962_v36  ;;  %v2973_v31 = vsel %vm2298_vm6, %v2962_v36, %v5137_v18  ;;  %v2881_v30 = vpop.permute.xlu0 %2880 }
 0x49b   :  { %2984 = vst [vmem:[#allocation5 + $0x38] sm:$0xf0] %v2972_v37  ;;  %2985 = vst [vmem:[#allocation5 + $0x40] sm:$0xf0] %v2973_v31 }
 0x49d   :  { %v3024_v58 = vpop.permute.xlu1 %3023 }
 0x49e   :  { %v3034_v61 = vsel %vm2357_vm7, %v3022_v26, %v3024_v58  ;;  %v3035_v1 = vsel %vm2357_vm7, %v3024_v58, %v5141_v22  ;;  %v5153_v35 = vpop.permute.xlu0 %2967  ;;  %v3183_v45 = vld [vmem:[#allocation5 + $0x8] sm:$0xff] }
 0x49f   :  { %3046 = vst [vmem:[#allocation5 + $0x68] sm:$0xf0] %v3034_v61  ;;  %3047 = vst [vmem:[#allocation5 + $0x70] sm:$0xf0] %v3035_v1  ;;  %v3207_v26 = vld [vmem:[#allocation5 + $0xc8] sm:$0xf] }
 0x4a0   :  { %v3225_v3 = vpack.c.bf16 %v3207_v26, %v3207_v26 }
 0x4a1   :  { %v3111_v38 = vpop.permute.xlu1 %3110 }
 0x4a2   :  { %v3121_v40 = vsel %vm2451_vm9, %v3109_v51, %v3111_v38  ;;  %v3122_v41 = vsel %vm2451_vm9, %v3111_v38, %v5145_v34  ;;  %v5158_v46 = vpop.permute.xlu0 %3029  ;;  %v3189_v55 = vld [vmem:[#allocation5 + $0x38] sm:$0xff] }
 0x4a3   :  { %3133 = vst [vmem:[#allocation5 + $0x98] sm:$0xf0] %v3121_v40  ;;  %3134 = vst [vmem:[#allocation5 + $0xa0] sm:$0xf0] %v3122_v41  ;;  %v3038_v10 = vsel %vm2357_vm7, %v5158_v46, %v5083_v63  ;;  %v3213_v28 = vpack.c.bf16 %v3189_v55, %v3183_v45 }
 0x4a4   :  { %3050 = vst [vmem:[#allocation5 + $0x88] sm:$0xf0] %v3038_v10 }
 0x4a5   :  { %v2879_v48 = vpop.permute.xlu1 %2878  ;;  %3259 = vmatprep.subr.bf16.mxu1 %v3213_v28 }
 0x4a6   :  { %v2887_v4 = vsel %vm2204_vm4, %v2877_v60, %v2879_v48  ;;  %v2888_v33 = vsel %vm2204_vm4, %v2879_v48, %v2881_v30  ;;  %3260 = vmatpush1.bf16.msra.mxu1 %v3212_v47  ;;  %v5165_v14 = vpop.permute.xlu0 %3116  ;;  %v3195_v54 = vld [vmem:[#allocation5 + $0x68] sm:$0xff] }
 0x4a7   :  { %2899 = vst [vmem:[#allocation5 + $0x18] sm:$0xf0] %v2887_v4  ;;  %2900 = vst [vmem:[#allocation5 + $0x20] sm:$0xf0] %v2888_v33  ;;  %v3125_v8 = vsel %vm2451_vm9, %v5165_v14, %v5094_v49  ;;  %v3218_v49 = vpack.c.bf16 %v3200_v20, %v3194_v62 }
 0x4a8   :  { %3137 = vst [vmem:[#allocation5 + $0xb8] sm:$0xf0] %v3125_v8  ;;  %v3196_v8 = vld [vmem:[#allocation5 + $0x70] sm:$0xff] }
 0x4a9   :  { %v2883_v63 = vpop.permute.xlu1 %2882 }
 0x4aa   :  { %v2889_v51 = vsel %vm2204_vm4, %v2881_v30, %v2883_v63  ;;  %v2833_v53 = vpop.permute.xlu0 %2832  ;;  %v3201_v21 = vld [vmem:[#allocation5 + $0x98] sm:$0xff]  ;;  %vm3240_vm4 = vcmask 1041408  }
 0x4ab   :  { %2901 = vst [vmem:[#allocation5 + $0x28] sm:$0xf0] %v2889_v51  ;;  %v2842_v44 = vsel %vm2157_vm3, %v5105_v50, %v2833_v53  ;;  %v2843_v56 = vsel %vm2157_vm3, %v2833_v53, %v5122_v2  ;;  %v3219_v43 = vpack.c.bf16 %v3201_v21, %v3195_v54  ;;  %v3242_v60 = vsel %vm3240_vm4, %v3224_v5, 0 }
 0x4ac   :  { %2854 = vst [vmem:[#allocation5 + $0x10] sm:$0xf] %v2842_v44  ;;  %2855 = vst [vmem:[#allocation5 + $0x18] sm:$0xf] %v2843_v56 }
 0x4ad   :  { %v2966_v0 = vpop.permute.xlu1 %2965  ;;  %3261 = vmatprep.subr.bf16.mxu1 %v3219_v43  ;;  %v3199_v43 = vld [vmem:[#allocation5 + $0x88] sm:$0xff] }
 0x4ae   :  { %v2974_v7 = vsel %vm2298_vm6, %v5137_v18, %v2966_v0  ;;  %v2975_v13 = vsel %vm2298_vm6, %v2966_v0, %v5153_v35  ;;  %3262 = vmatpush1.bf16.msra.mxu1 %v3218_v49  ;;  %v2920_v50 = vpop.permute.xlu0 %2919 }
 0x4af   :  { %2986 = vst [vmem:[#allocation5 + $0x48] sm:$0xf0] %v2974_v7  ;;  %2987 = vst [vmem:[#allocation5 + $0x50] sm:$0xf0] %v2975_v13  ;;  %3676 = vmatprep.subr.msk.bf16.mxu1 %vm3240_vm4, %v3225_v3  ;;  %v2929_v15 = vsel %vm2251_vm5, %v5107_v52, %v2920_v50  ;;  %v2930_v11 = vsel %vm2251_vm5, %v2920_v50, %v5128_v32 }
 0x4b0   :  { %2941 = vst [vmem:[#allocation5 + $0x40] sm:$0xf] %v2929_v15  ;;  %2942 = vst [vmem:[#allocation5 + $0x48] sm:$0xf] %v2930_v11 }
 0x4b1   :  { %v2970_v16 = vpop.permute.xlu1 %2969 }
 0x4b2   :  { %v2976_v18 = vsel %vm2298_vm6, %v5153_v35, %v2970_v16  ;;  %3264 = vmatpush1.bf16.msra.mxu1 %v3242_v60  ;;  %v3069_v25 = vpop.permute.xlu0 %3068 }
 0x4b3   :  { %2988 = vst [vmem:[#allocation5 + $0x58] sm:$0xf0] %v2976_v18  ;;  %v3078_v52 = vsel %vm2404_vm8, %v5112_v12, %v3069_v25  ;;  %v3079_v29 = vsel %vm2404_vm8, %v3069_v25, %v5135_v57  ;;  %v3185_v58 = vld [vmem:[#allocation5 + $0x18] sm:$0xff]  ;;  %v3184_v35 = vld [vmem:[#allocation5 + $0x10] sm:$0xff] }
 0x4b4   :  { %3090 = vst [vmem:[#allocation5 + $0xa0] sm:$0xf] %v3078_v52  ;;  %3091 = vst [vmem:[#allocation5 + $0xa8] sm:$0xf] %v3079_v29 }
 0x4b5   :  { %v3028_v36 = vpop.permute.xlu1 %3027  ;;  %3677 = vmatmul.mubr.msk.bf16.vlgmr.msra.gmra.mrb[20].mxu1 %vm3236_vm11, %v5190_v27 }
 0x4b6   :  { %v3036_v37 = vsel %vm2357_vm7, %v5141_v22, %v3028_v36  ;;  %v3037_v31 = vsel %vm2357_vm7, %v3028_v36, %v5158_v46  ;;  %v3156_v30 = vpop.permute.xlu0 %3155  ;;  %3332 = vmatprep.mubr.bf16.mxu1 %v3881_v9 }
 0x4b7   :  { %3048 = vst [vmem:[#allocation5 + $0x78] sm:$0xf0] %v3036_v37  ;;  %3049 = vst [vmem:[#allocation5 + $0x80] sm:$0xf0] %v3037_v31  ;;  %v3165_v12 = vsel %vm2498_vm10, %v5117_v59, %v3156_v30  ;;  %v3166_v61 = vsel %vm2498_vm10, %v3156_v30, %v5139_v23  ;;  %v3191_v1 = vld [vmem:[#allocation5 + $0x48] sm:$0xff]  ;;  %v3190_v38 = vld [vmem:[#allocation5 + $0x40] sm:$0xff] }
 0x4b8   :  { %3177 = vst [vmem:[#allocation5 + $0xd0] sm:$0xf] %v3165_v12  ;;  %3178 = vst [vmem:[#allocation5 + $0xd8] sm:$0xf] %v3166_v61  ;;  %v3215_v22 = vpack.c.bf16 %v3191_v1, %v3185_v58  ;;  %v3214_v39 = vpack.c.bf16 %v3190_v38, %v3184_v35 }
 0x4b9   :  { %v3115_v40 = vpop.permute.xlu1 %3114 }
 0x4ba   :  { %v3123_v41 = vsel %vm2451_vm9, %v5145_v34, %v3115_v40  ;;  %v3124_v9 = vsel %vm2451_vm9, %v3115_v40, %v5165_v14  ;;  %3300 = vmatprep.subr.bf16.mxu1 %v3215_v22  ;;  %v2837_v46 = vpop.permute.xlu0 %2836 }
 0x4bb   :  { %3135 = vst [vmem:[#allocation5 + $0xa8] sm:$0xf0] %v3123_v41  ;;  %3136 = vst [vmem:[#allocation5 + $0xb0] sm:$0xf0] %v3124_v9  ;;  %v2844_v59 = vsel %vm2157_vm3, %v5122_v2, %v2837_v46  ;;  %v2845_v45 = vsel %vm2157_vm3, %v2837_v46, %v5125_v6  ;;  %3301 = vmatpush1.bf16.msra.mxu1 %v3214_v39  ;;  %v3202_v19 = vld [vmem:[#allocation5 + $0xa0] sm:$0xff] }
 0x4bc   :  { %2856 = vst [vmem:[#allocation5 + $0x20] sm:$0xf] %v2844_v59  ;;  %2857 = vst [vmem:[#allocation5 + $0x28] sm:$0xf] %v2845_v45 }
 0x4be   :  { %v2924_v55 = vpop.permute.xlu0 %2923  ;;  %v3197_v28 = vld [vmem:[#allocation5 + $0x78] sm:$0xff]  ;;  %v3198_v49 = vld [vmem:[#allocation5 + $0x80] sm:$0xff] }
 0x4bf   :  { %v2931_v34 = vsel %vm2251_vm5, %v5128_v32, %v2924_v55  ;;  %v2932_v10 = vsel %vm2251_vm5, %v2924_v55, %v5133_v17  ;;  %v3209_v2 = vld [vmem:[#allocation5 + $0xd8] sm:$0xf]  ;;  %v3208_v4 = vld [vmem:[#allocation5 + $0xd0] sm:$0xf]  ;;  %v3220_v32 = vpack.c.bf16 %v3202_v19, %v3196_v8  ;;  %v3162_v17 = vpop.permute.xlu1 %3161 }
 0x4c0   :  { %2943 = vst [vmem:[#allocation5 + $0x50] sm:$0xf] %v2931_v34  ;;  %2944 = vst [vmem:[#allocation5 + $0x58] sm:$0xf] %v2932_v10  ;;  %v3227_v63 = vpack.c.bf16 %v3209_v2, %v3209_v2  ;;  %v3226_v20 = vpack.c.bf16 %v3208_v4, %v3208_v4 }
 0x4c2   :  { %v3073_v47 = vpop.permute.xlu0 %3072  ;;  %v3203_v48 = vld [vmem:[#allocation5 + $0xa8] sm:$0xff]  ;;  %v3248_v56 = vsel %vm3240_vm4, %v3226_v20, 0 }
 0x4c3   :  { %v3080_v6 = vsel %vm2404_vm8, %v5135_v57, %v3073_v47  ;;  %v3081_v33 = vsel %vm2404_vm8, %v3073_v47, %v5088_v42  ;;  %v3221_v14 = vpack.c.bf16 %v3203_v48, %v3197_v28  ;;  %v3187_v51 = vld [vmem:[#allocation5 + $0x28] sm:$0xff]  ;;  %v3186_v54 = vld [vmem:[#allocation5 + $0x20] sm:$0xff] }
 0x4c4   :  { %3092 = vst [vmem:[#allocation5 + $0xb0] sm:$0xf] %v3080_v6  ;;  %3093 = vst [vmem:[#allocation5 + $0xb8] sm:$0xf] %v3081_v33 }
 0x4c5   :  { %3302 = vmatprep.subr.bf16.mxu1 %v3221_v14 }
 0x4c6   :  { %3303 = vmatpush1.bf16.msra.mxu1 %v3220_v32  ;;  %v3160_v26 = vpop.permute.xlu0 %3159 }
 0x4c7   :  { %3678 = vmatprep.subr.msk.bf16.mxu1 %vm3240_vm4, %v3227_v63  ;;  %v3167_v57 = vsel %vm2498_vm10, %v5139_v23, %v3160_v26  ;;  %v3168_v53 = vsel %vm2498_vm10, %v3160_v26, %v3162_v17  ;;  %v3193_v42 = vld [vmem:[#allocation5 + $0x58] sm:$0xff]  ;;  %v3192_v21 = vld [vmem:[#allocation5 + $0x50] sm:$0xff] }
 0x4c8   :  { %3179 = vst [vmem:[#allocation5 + $0xe0] sm:$0xf] %v3167_v57  ;;  %3180 = vst [vmem:[#allocation5 + $0xe8] sm:$0xf] %v3168_v53  ;;  %v3217_v24 = vpack.c.bf16 %v3193_v42, %v3187_v51  ;;  %v3216_v44 = vpack.c.bf16 %v3192_v21, %v3186_v54 }
 0x4ca   :  { %3305 = vmatpush1.bf16.msra.mxu1 %v3248_v56  ;;  %3341 = vmatprep.subr.bf16.mxu0 %v3217_v24 }
 0x4cb   :  { %3342 = vmatpush1.bf16.msra.mxu0 %v3216_v44  ;;  %v3205_v62 = vld [vmem:[#allocation5 + $0xb8] sm:$0xff]  ;;  %v3204_v0 = vld [vmem:[#allocation5 + $0xb0] sm:$0xff] }
 0x4cc   :  { %v3223_v3 = vpack.c.bf16 %v3205_v62, %v3199_v43  ;;  %v3222_v23 = vpack.c.bf16 %v3204_v0, %v3198_v49 }
 0x4cd   :  { %3679 = vmatmul.mubr.msk.bf16.vlgmr.msra.gmra.mrb[24].mxu1 %vm3236_vm11, %v5190_v27 }
 0x4ce   :  { %3343 = vmatprep.subr.bf16.mxu0 %v3223_v3 }
 0x4cf   :  { %3344 = vmatpush1.bf16.msra.mxu0 %v3222_v23  ;;  %v3211_v5 = vld [vmem:[#allocation5 + $0xe8] sm:$0xf]  ;;  %v3210_v7 = vld [vmem:[#allocation5 + $0xe0] sm:$0xf] }
 0x4d0   :  { %v3229_v13 = vpack.c.bf16 %v3211_v5, %v3211_v5  ;;  %v3228_v50 = vpack.c.bf16 %v3210_v7, %v3210_v7 }
 0x4d2   :  { %3680 = vmatprep.subr.msk.bf16.mxu0 %vm3240_vm4, %v3229_v13  ;;  %v3254_v15 = vsel %vm3240_vm4, %v3228_v50, 0 }
 0x4d3   :  { %3346 = vmatpush1.bf16.msra.mxu0 %v3254_v15 }
 0x4d6   :  { %3681 = vmatmul.mubr.msk.bf16.vlgmr.msra.gmra.mrb[24].mxu0 %vm3236_vm11, %v5190_v27 }
 0x4d7   :  { %v3234_v11 = vpop.permute.xlu0 %3233 }
 0x588   :  { %v3293_v16 = vpop.f32.mrb[20].mxu1 }
 0x589   :  { %v3294_v60 = vadd.f32 %v3293_v16, %v3234_v11  ;;  %v3295_v18 = vpop.f32.mrb[21].mxu1 }
 0x58a   :  { %v3296_v25 = vadd.f32 %v3295_v18, %v3234_v11  ;;  %v3297_v52 = vpop.f32.mrb[22].mxu1 }
 0x58b   :  { %v3382_v29 = vmax.f32 %v3294_v60, 0.0  ;;  %v3298_v36 = vpop.f32.mrb[23].mxu1 }
 0x58c   :  { %v3383_v37 = vmax.f32 %v3296_v25, 0.0 }
 0x58e   :  { %v3394_v31 = vcombine.low %v3382_v29, %v3383_v37 }
 0x590   :  { %3400 = vst [vmem:[%s5253_s10] sm:$0xff] %v3394_v31 }
 0x5a0   :  { %v3334_v30 = vpop.f32.mrb[24].mxu1 }
 0x5a1   :  { %v3335_v58 = vadd.f32 %v3334_v30, %v3234_v11  ;;  %v3336_v12 = vpop.f32.mrb[25].mxu1 }
 0x5a2   :  { %v3337_v61 = vadd.f32 %v3336_v12, %v3234_v11  ;;  %v3338_v1 = vpop.f32.mrb[26].mxu1 }
 0x5a3   :  { %v3384_v27 = vmax.f32 %v3335_v58, 0.0  ;;  %v3339_v35 = vpop.f32.mrb[27].mxu1 }
 0x5a4   :  { %v3385_v38 = vmax.f32 %v3337_v61, 0.0 }
 0x5a6   :  { %v3395_v22 = vcombine.low %v3384_v27, %v3385_v38 }
 0x5a8   :  { %3401 = vst [vmem:[%s5253_s10 + $0x8] sm:$0xff] %v3395_v22 }
 0x5a9   :  { %v3375_v39 = vpop.f32.mrb[24].mxu0 }
 0x5aa   :  { %v3376_v40 = vadd.f32 %v3375_v39, %v3234_v11  ;;  %v3377_v41 = vpop.f32.mrb[25].mxu0 }
 0x5ab   :  { %v3378_v9 = vadd.f32 %v3377_v41, %v3234_v11  ;;  %v3379_v46 = vpop.f32.mrb[26].mxu0 }
 0x5ac   :  { %v3386_v59 = vmax.f32 %v3376_v40, 0.0  ;;  %v3380_v45 = vpop.f32.mrb[27].mxu0 }
 0x5ad   :  { %v3387_v55 = vmax.f32 %v3378_v9, 0.0 }
 0x5af   :  { %v3396_v34 = vcombine.low %v3386_v59, %v3387_v55 }
 0x5b1   :  { %3402 = vst [vmem:[%s5253_s10 + $0x10] sm:$0xff] %v3396_v34 }

</bundles_post_ra>
